<compile_context>
chip_gen: v7x
topology: tpu7x:2x2x1
jax: 0.10.0
libtpu: 0.0.40
codegen_flags: <defaults>
</compile_context>

<pallas_src>
import functools

import jax
import jax.numpy as jnp
from jax import lax
from jax.experimental import pallas as pl
from jax.experimental.pallas import tpu as pltpu

# ------------------------------------------------------------------ config ----
CFG = dict(
    vocab=64,
    max_pos=16,
    hidden=32,
    heads=2,
    intermediate=64,
    layers=2,
    num_labels=2,      # len(Verbalizer[task_name]) — e.g. SST-2
    pad_id=1,          # RoBERTa padding_idx
    ln_eps=1e-5,
)

LANES = 128            # lane-dense width used for every packed slab and the output

_VMEM = pl.BlockSpec(memory_space=pltpu.MemorySpace.VMEM)


# ------------------------------------------------------------ fused kernel ----
def _fused_forward_kernel(data_ref, w_ref, p_ref, out_ref,
                          *, B, S, H, NH, DH, I, L, NL, eps):
    f32, bf16 = jnp.float32, jnp.bfloat16
    BS = B * S
    scale = 1.0 / (DH ** 0.5)

    # ---- static row offsets inside the packed slabs (all slices below are static) ----
    W_QKV = 0                 # L*H rows, cols [0:3H] = wqkv (padded to 128)
    W_OI = L * H              # L*H rows, cols [0:H] = wo, [H:H+I] = wi
    W_F = 2 * L * H           # L*I rows, cols [0:H] = wf
    W_W1 = 2 * L * H + L * I  # H rows,   cols [0:H] = cls dense weight
    W_W2 = W_W1 + H           # H rows,   cols [0:128] = cls out weight (padded)

    P_EMB_LN = 0              # [emb_ln_g | emb_ln_b]
    P_BIAS = 1                # per layer: [bo | bi | bf]  (H+I+H = 128)
    P_LN = 1 + L              # per layer: [ln1_g | ln1_b | ln2_g | ln2_b]  (4H = 128)
    P_BQKV = 1 + 2 * L        # per layer: bqkv padded to 128
    P_B1 = 1 + 3 * L          # cls dense bias
    P_B2 = 2 + 3 * L          # cls out bias (padded to 128)

    def ln(x, g, b):          # residual already folded into x; f32 math
        mu = jnp.mean(x, axis=-1, keepdims=True)
        var = jnp.mean(jnp.square(x - mu), axis=-1, keepdims=True)
        return (x - mu) * lax.rsqrt(var + eps) * g + b

    def mm(x, w, b=None):     # bf16 MXU matmul, f32 accumulate, f32 bias add
        y = jnp.dot(x.astype(bf16), w, preferred_element_type=f32)
        if b is not None:
            y = y + b
        return y

    # ---- per-call data slab: embeddings | block-diag additive mask | one-hot labels ----
    emb = data_ref[:, 0:H]                           # (BS, H) f32
    mask = data_ref[:, H:H + BS]                     # (BS, BS) f32, 0 / -1e9
    onehot = data_ref[0:B, H + BS:H + BS + NL]       # (B, NL) f32

    x = ln(emb, p_ref[P_EMB_LN:P_EMB_LN + 1, 0:H], p_ref[P_EMB_LN:P_EMB_LN + 1, H:2 * H])

    # ------------------------------------------------ transformer layers ----
    for l in range(L):
        wqkv = w_ref[W_QKV + l * H: W_QKV + (l + 1) * H, :]        # (H, 128) bf16
        bqkv = p_ref[P_BQKV + l: P_BQKV + l + 1, :]                # (1, 128) f32
        qkv = mm(x, wqkv, bqkv)                                    # (BS, 128) lane-dense

        # hoist bf16 casts: once per layer, not per head
        q = qkv[:, 0:H].astype(bf16)
        k = qkv[:, H:2 * H].astype(bf16)
        v = qkv[:, 2 * H:3 * H].astype(bf16)

        # batched attention: all examples handled by one (BS,BS) matmul per head via the
        # block-diagonal mask; head contexts stay in vregs and are concatenated (no scratch).
        ctx_heads = []
        for h in range(NH):
            cs = slice(h * DH, (h + 1) * DH)
            s = lax.dot_general(q[:, cs], k[:, cs], (((1,), (1,)), ((), ())),
                                preferred_element_type=f32) * scale + mask   # (BS, BS)
            m = jnp.max(s, axis=-1, keepdims=True)
            p = jnp.exp(s - m)
            p = p * pl.reciprocal(jnp.sum(p, axis=-1, keepdims=True), approx=True)
            ctx_heads.append(jnp.dot(p.astype(bf16), v[:, cs],
                                     preferred_element_type=f32))            # (BS, DH)
        ctx = jnp.concatenate(ctx_heads, axis=-1)                            # (BS, H)

        wo = w_ref[W_OI + l * H: W_OI + (l + 1) * H, 0:H]
        wi = w_ref[W_OI + l * H: W_OI + (l + 1) * H, H:H + I]
        wf = w_ref[W_F + l * I: W_F + (l + 1) * I, 0:H]
        bias_row = p_ref[P_BIAS + l: P_BIAS + l + 1, :]
        ln_row = p_ref[P_LN + l: P_LN + l + 1, :]

        attn = mm(ctx, wo, bias_row[:, 0:H])                                 # (BS, H)
        x = ln(attn + x, ln_row[:, 0:H], ln_row[:, H:2 * H])                 # residual + LN

        inter = mm(x, wi, bias_row[:, H:H + I])                              # (BS, I)
        # TODO(synk): HF RoBERTa uses exact (erf) GELU; tanh-approx GELU used here.
        inter = jax.nn.gelu(inter, approximate=True)
        ffn = mm(inter, wf, bias_row[:, H + I:H + I + H])                    # (BS, H)
        x = ln(ffn + x, ln_row[:, 2 * H:3 * H], ln_row[:, 3 * H:4 * H])

    # ------------------------------------------ classification head (CLS) ----
    # static slice/concat of the <s> rows (row b*S of each sequence) — no one-hot matmul
    cls = jnp.concatenate([x[b * S:b * S + 1, :] for b in range(B)], axis=0)  # (B, H)

    w1 = w_ref[W_W1:W_W1 + H, 0:H]
    b1 = p_ref[P_B1:P_B1 + 1, 0:H]
    w2 = w_ref[W_W2:W_W2 + H, :]          # (H, 128) padded -> lane-dense final result
    b2 = p_ref[P_B2:P_B2 + 1, :]

    h1 = jnp.tanh(mm(cls, w1, b1))                                           # (B, H)
    logits_full = mm(h1, w2, b2)                                             # (B, 128)

    # ------------------------------------------------------ cross-entropy ----
    lg = logits_full[:, 0:NL]
    m = jnp.max(lg, axis=-1, keepdims=True)
    lse = m + jnp.log(jnp.sum(jnp.exp(lg - m), axis=-1, keepdims=True))
    tgt = jnp.sum(lg * onehot, axis=-1, keepdims=True)
    mean_loss = jnp.mean(lse - tgt)

    # pack the mean loss into spare lane NL of the already lane-dense logits slab
    col = lax.broadcasted_iota(jnp.int32, (B, LANES), 1)
    out_ref[...] = jnp.where(col == NL, mean_loss, logits_full)


# ------------------------------------------------------------------ params ----
def init_params(key, cfg):
    H, I = cfg["hidden"], cfg["intermediate"]
    L, NL = cfg["layers"], cfg["num_labels"]
    ks = iter(jax.random.split(key, 32))

    def w(shape):
        return 0.02 * jax.random.normal(next(ks), shape, jnp.float32)

    return {
        "word_emb": w((cfg["vocab"], H)),
        "pos_emb": w((cfg["max_pos"], H)),
        "tok_emb": w((1, H)),
        "emb_ln": jnp.stack([jnp.ones((H,), jnp.float32),
                             jnp.zeros((H,), jnp.float32)], axis=0),        # (2, H)
        "wqkv": w((L, H, 3 * H)), "bqkv": jnp.zeros((L, 3 * H), jnp.float32),
        "wo":   w((L, H, H)),     "bo":   jnp.zeros((L, H), jnp.float32),
        "ln1":  jnp.stack([jnp.ones((L, H), jnp.float32),
                           jnp.zeros((L, H), jnp.float32)], axis=1),        # (L, 2, H)
        "wi":   w((L, H, I)),     "bi":   jnp.zeros((L, I), jnp.float32),
        "wf":   w((L, I, H)),     "bf":   jnp.zeros((L, H), jnp.float32),
        "ln2":  jnp.stack([jnp.ones((L, H), jnp.float32),
                           jnp.zeros((L, H), jnp.float32)], axis=1),
        "cls_dense": {"w": w((H, H)), "b": jnp.zeros((H,), jnp.float32)},
        "cls_out":   {"w": w((H, NL)), "b": jnp.zeros((NL,), jnp.float32)},
    }


def pack_params(params, cfg):
    """One-time packing: bf16 weight slab + f32 bias/LN slab (both 128-lane dense)."""
    H, I = cfg["hidden"], cfg["intermediate"]
    L = cfg["layers"]

    def pad_cols(a):
        return jnp.pad(a, ((0, 0), (0, LANES - a.shape[1])))

    wslab = jnp.concatenate([
        pad_cols(params["wqkv"].reshape(L * H, 3 * H)),                      # W_QKV
        pad_cols(jnp.concatenate([params["wo"].reshape(L * H, H),
                                  params["wi"].reshape(L * H, I)], axis=1)),  # W_OI
        pad_cols(params["wf"].reshape(L * I, H)),                            # W_F
        pad_cols(params["cls_dense"]["w"]),                                  # W_W1
        pad_cols(params["cls_out"]["w"]),                                    # W_W2
    ], axis=0).astype(jnp.bfloat16)                                          # (320, 128)

    def row(*pieces):
        return pad_cols(jnp.concatenate([p.reshape(1, -1) for p in pieces], axis=1))

    p_rows = [row(params["emb_ln"][0], params["emb_ln"][1])]                 # P_EMB_LN
    for l in range(L):                                                       # P_BIAS
        p_rows.append(row(params["bo"][l], params["bi"][l], params["bf"][l]))
    for l in range(L):                                                       # P_LN
        p_rows.append(row(params["ln1"][l, 0], params["ln1"][l, 1],
                          params["ln2"][l, 0], params["ln2"][l, 1]))
    for l in range(L):                                                       # P_BQKV
        p_rows.append(row(params["bqkv"][l]))
    p_rows.append(row(params["cls_dense"]["b"]))                             # P_B1
    p_rows.append(row(params["cls_out"]["b"]))                               # P_B2
    pslab = jnp.concatenate(p_rows, axis=0).astype(jnp.float32)
    pad_r = (-pslab.shape[0]) % 8
    if pad_r:
        pslab = jnp.pad(pslab, ((0, pad_r), (0, 0)))

    return {
        "word_emb": params["word_emb"],
        "pos_emb": params["pos_emb"],
        "tok_emb": params["tok_emb"],
        "wslab": wslab,
        "pslab": pslab,
    }


# ----------------------------------------------------------------- forward ----
def conventional_tuning_forward(packed, input_ids, attention_mask, labels=None, cfg=CFG):
    B, S = input_ids.shape
    H, NH = cfg["hidden"], cfg["heads"]
    I, L, NL = cfg["intermediate"], cfg["layers"], cfg["num_labels"]
    DH = H // NH
    BS = B * S
    assert H + BS + NL <= LANES and H + I + H == LANES and 4 * H == LANES

    # --- embeddings (tiny data-dependent gathers stay in XLA; everything after is in-kernel) ---
    pad = cfg["pad_id"]
    not_pad = (input_ids != pad).astype(jnp.int32)
    position_ids = jnp.cumsum(not_pad, axis=1) * not_pad + pad            # RoBERTa position ids
    emb = (packed["word_emb"][input_ids]
           + packed["pos_emb"][position_ids]
           + packed["tok_emb"][0][None, None, :]).reshape(BS, H).astype(jnp.float32)

    # block-diagonal additive mask over keys: 0 where (same example AND not padding), else -1e9
    key_valid = attention_mask.astype(jnp.float32)                        # (B, S)
    same_batch = jnp.eye(B, dtype=jnp.float32)
    valid = jnp.broadcast_to(
        same_batch[:, None, :, None] * key_valid[None, None, :, :], (B, S, B, S))
    mask_bd = (valid.reshape(BS, BS) - 1.0) * 1e9                         # (BS, BS)

    lbl = labels if labels is not None else jnp.zeros((B,), jnp.int32)
    onehot = jax.nn.one_hot(lbl.astype(jnp.int32), NL, dtype=jnp.float32)
    oh_full = jnp.zeros((BS, NL), jnp.float32).at[:B, :].set(onehot)

    # single per-call f32 data slab: [emb | mask | one-hot labels | zero pad] -> one DMA
    data = jnp.concatenate([emb, mask_bd, oh_full], axis=1)
    data = jnp.pad(data, ((0, 0), (0, LANES - data.shape[1])))            # (BS, 128)

    kernel = functools.partial(_fused_forward_kernel, B=B, S=S, H=H, NH=NH, DH=DH,
                               I=I, L=L, NL=NL, eps=cfg["ln_eps"])

    # single pallas_call, 3 VMEM inputs, 1 lane-dense VMEM output, no grid
    slab = pl.pallas_call(
        kernel,
        out_shape=jax.ShapeDtypeStruct((B, LANES), jnp.float32),
        in_specs=[_VMEM, _VMEM, _VMEM],
        out_specs=_VMEM,
    )(data, packed["wslab"], packed["pslab"])

    logits = slab[:, :NL]
    loss = slab[0, NL] if labels is not None else None
    return {"loss": loss, "logits": logits}


# -------------------------------------------------------------------- main ----
if __name__ == "__main__":
    key = jax.random.PRNGKey(0)
    k_param, k_ids, k_lbl = jax.random.split(key, 3)

    params = init_params(k_param, CFG)
    packed = pack_params(params, CFG)     # one-time bf16 cast + padding (not per forward call)

    B, S = 2, 8
    input_ids = jax.random.randint(k_ids, (B, S), 2, CFG["vocab"], dtype=jnp.int32)
    # mark the last two tokens of the second example as padding
    input_ids = input_ids.at[1, -2:].set(CFG["pad_id"])
    attention_mask = (input_ids != CFG["pad_id"]).astype(jnp.int32)
    labels = jax.random.randint(k_lbl, (B,), 0, CFG["num_labels"], dtype=jnp.int32)

    fwd = jax.jit(lambda pk, ids, msk, lbls: conventional_tuning_forward(pk, ids, msk, lbls))
    out = fwd(packed, input_ids, attention_mask, labels)
    jax.block_until_ready(out["logits"])
    jax.block_until_ready(out["loss"])

    assert out["logits"].shape == (B, CFG["num_labels"])
    assert out["loss"].shape == ()
    assert bool(jnp.isfinite(out["loss"])) and bool(jnp.all(jnp.isfinite(out["logits"])))
    print("KERNEL_OK")
</pallas_src>

<mosaic_0001>
module attributes {stable_mosaic.version = 11 : i64} {
  func.func @_fused_forward_kernel(%arg0: memref<16x128xf32, #tpu.memory_space<vmem>>, %arg1: memref<320x128xbf16, #tpu.memory_space<vmem>>, %arg2: memref<16x128xf32, #tpu.memory_space<vmem>>, %arg3: memref<2x128xf32, #tpu.memory_space<vmem>>) attributes {dimension_semantics = [], scalar_prefetch = 0 : i64, scratch_operands = 0 : i64, tpu.core_type = #tpu.core_type<tc>} {
    %c0 = arith.constant 0 : index
    %c0_0 = arith.constant 0 : index
    %0 = vector.load %arg0[%c0, %c0_0] : memref<16x128xf32, #tpu.memory_space<vmem>>, vector<16x32xf32>
    %c0_1 = arith.constant 0 : index
    %c32 = arith.constant 32 : index
    %1 = vector.load %arg0[%c0_1, %c32] : memref<16x128xf32, #tpu.memory_space<vmem>>, vector<16x16xf32>
    %c0_2 = arith.constant 0 : index
    %c48 = arith.constant 48 : index
    %2 = vector.load %arg0[%c0_2, %c48] : memref<16x128xf32, #tpu.memory_space<vmem>>, vector<2x2xf32>
    %c0_3 = arith.constant 0 : index
    %c0_4 = arith.constant 0 : index
    %3 = vector.load %arg2[%c0_3, %c0_4] : memref<16x128xf32, #tpu.memory_space<vmem>>, vector<1x32xf32>
    %c0_5 = arith.constant 0 : index
    %c32_6 = arith.constant 32 : index
    %4 = vector.load %arg2[%c0_5, %c32_6] : memref<16x128xf32, #tpu.memory_space<vmem>>, vector<1x32xf32>
    %cst = arith.constant dense<0.000000e+00> : vector<16xf32>
    %5 = vector.multi_reduction <add>, %0, %cst [1] : vector<16x32xf32> to vector<16xf32>
    %6 = vector.shape_cast %5 : vector<16xf32> to vector<16x1xf32>
    %cst_7 = arith.constant 3.200000e+01 : f32
    %7 = vector.broadcast %cst_7 : f32 to vector<16x1xf32>
    %8 = arith.divf %6, %7 : vector<16x1xf32>
    %9 = vector.broadcast %8 : vector<16x1xf32> to vector<16x32xf32>
    %10 = arith.subf %0, %9 : vector<16x32xf32>
    %11 = arith.mulf %10, %10 : vector<16x32xf32>
    %cst_8 = arith.constant dense<0.000000e+00> : vector<16xf32>
    %12 = vector.multi_reduction <add>, %11, %cst_8 [1] : vector<16x32xf32> to vector<16xf32>
    %13 = vector.shape_cast %12 : vector<16xf32> to vector<16x1xf32>
    %cst_9 = arith.constant 3.200000e+01 : f32
    %14 = vector.broadcast %cst_9 : f32 to vector<16x1xf32>
    %15 = arith.divf %13, %14 : vector<16x1xf32>
    %16 = vector.broadcast %8 : vector<16x1xf32> to vector<16x32xf32>
    %17 = arith.subf %0, %16 : vector<16x32xf32>
    %cst_10 = arith.constant 9.99999974E-6 : f32
    %18 = vector.broadcast %cst_10 : f32 to vector<16x1xf32>
    %19 = arith.addf %15, %18 : vector<16x1xf32>
    %20 = math.rsqrt %19 : vector<16x1xf32>
    %21 = vector.broadcast %20 : vector<16x1xf32> to vector<16x32xf32>
    %22 = arith.mulf %17, %21 : vector<16x32xf32>
    %23 = vector.broadcast %3 : vector<1x32xf32> to vector<16x32xf32>
    %24 = arith.mulf %22, %23 : vector<16x32xf32>
    %25 = vector.broadcast %4 : vector<1x32xf32> to vector<16x32xf32>
    %26 = arith.addf %24, %25 : vector<16x32xf32>
    %c0_11 = arith.constant 0 : index
    %c0_12 = arith.constant 0 : index
    %27 = vector.load %arg1[%c0_11, %c0_12] : memref<320x128xbf16, #tpu.memory_space<vmem>>, vector<32x128xbf16>
    %c5 = arith.constant 5 : index
    %c0_13 = arith.constant 0 : index
    %28 = vector.load %arg2[%c5, %c0_13] : memref<16x128xf32, #tpu.memory_space<vmem>>, vector<1x128xf32>
    %29 = arith.truncf %26 : vector<16x32xf32> to vector<16x32xbf16>
    %cst_14 = arith.constant dense<0.000000e+00> : vector<16x128xf32>
    %30 = tpu.matmul %29, %27, %cst_14 {dimension_numbers = #tpu.dot_dimension_numbers<[1], [0], [0], [1], [0, 0, 1, 1], [], []>} : vector<16x32xbf16>, vector<32x128xbf16>, vector<16x128xf32> -> vector<16x128xf32>
    %31 = vector.broadcast %28 : vector<1x128xf32> to vector<16x128xf32>
    %32 = arith.addf %30, %31 : vector<16x128xf32>
    %33 = vector.extract_strided_slice %32 {offsets = [0, 0], sizes = [16, 32], strides = [1, 1]} : vector<16x128xf32> to vector<16x32xf32>
    %34 = arith.truncf %33 : vector<16x32xf32> to vector<16x32xbf16>
    %35 = vector.extract_strided_slice %32 {offsets = [0, 32], sizes = [16, 32], strides = [1, 1]} : vector<16x128xf32> to vector<16x32xf32>
    %36 = arith.truncf %35 : vector<16x32xf32> to vector<16x32xbf16>
    %37 = vector.extract_strided_slice %32 {offsets = [0, 64], sizes = [16, 32], strides = [1, 1]} : vector<16x128xf32> to vector<16x32xf32>
    %38 = arith.truncf %37 : vector<16x32xf32> to vector<16x32xbf16>
    %39 = vector.extract_strided_slice %34 {offsets = [0, 0], sizes = [16, 16], strides = [1, 1]} : vector<16x32xbf16> to vector<16x16xbf16>
    %40 = vector.extract_strided_slice %36 {offsets = [0, 0], sizes = [16, 16], strides = [1, 1]} : vector<16x32xbf16> to vector<16x16xbf16>
    %cst_15 = arith.constant dense<0.000000e+00> : vector<16x16xf32>
    %41 = tpu.matmul %39, %40, %cst_15 {dimension_numbers = #tpu.dot_dimension_numbers<[1], [1], [0], [0], [0, 0, 1, 0], [], []>} : vector<16x16xbf16>, vector<16x16xbf16>, vector<16x16xf32> -> vector<16x16xf32>
    %cst_16 = arith.constant 2.500000e-01 : f32
    %42 = vector.broadcast %cst_16 : f32 to vector<16x16xf32>
    %43 = arith.mulf %41, %42 : vector<16x16xf32>
    %44 = arith.addf %43, %1 : vector<16x16xf32>
    %cst_17 = arith.constant dense<0xFF800000> : vector<16xf32>
    %45 = vector.multi_reduction <maximumf>, %44, %cst_17 [1] : vector<16x16xf32> to vector<16xf32>
    %46 = vector.shape_cast %45 : vector<16xf32> to vector<16x1xf32>
    %47 = vector.broadcast %46 : vector<16x1xf32> to vector<16x16xf32>
    %48 = arith.subf %44, %47 : vector<16x16xf32>
    %49 = math.exp %48 : vector<16x16xf32>
    %cst_18 = arith.constant dense<0.000000e+00> : vector<16xf32>
    %50 = vector.multi_reduction <add>, %49, %cst_18 [1] : vector<16x16xf32> to vector<16xf32>
    %51 = vector.shape_cast %50 : vector<16xf32> to vector<16x1xf32>
    %52 = tpu.reciprocal %51 {approx = true} : vector<16x1xf32> -> vector<16x1xf32>
    %53 = vector.broadcast %52 : vector<16x1xf32> to vector<16x16xf32>
    %54 = arith.mulf %49, %53 : vector<16x16xf32>
    %55 = arith.truncf %54 : vector<16x16xf32> to vector<16x16xbf16>
    %56 = vector.extract_strided_slice %38 {offsets = [0, 0], sizes = [16, 16], strides = [1, 1]} : vector<16x32xbf16> to vector<16x16xbf16>
    %cst_19 = arith.constant dense<0.000000e+00> : vector<16x16xf32>
    %57 = tpu.matmul %55, %56, %cst_19 {dimension_numbers = #tpu.dot_dimension_numbers<[1], [0], [0], [1], [0, 0, 1, 1], [], []>} : vector<16x16xbf16>, vector<16x16xbf16>, vector<16x16xf32> -> vector<16x16xf32>
    %58 = vector.extract_strided_slice %34 {offsets = [0, 16], sizes = [16, 16], strides = [1, 1]} : vector<16x32xbf16> to vector<16x16xbf16>
    %59 = vector.extract_strided_slice %36 {offsets = [0, 16], sizes = [16, 16], strides = [1, 1]} : vector<16x32xbf16> to vector<16x16xbf16>
    %cst_20 = arith.constant dense<0.000000e+00> : vector<16x16xf32>
    %60 = tpu.matmul %58, %59, %cst_20 {dimension_numbers = #tpu.dot_dimension_numbers<[1], [1], [0], [0], [0, 0, 1, 0], [], []>} : vector<16x16xbf16>, vector<16x16xbf16>, vector<16x16xf32> -> vector<16x16xf32>
    %cst_21 = arith.constant 2.500000e-01 : f32
    %61 = vector.broadcast %cst_21 : f32 to vector<16x16xf32>
    %62 = arith.mulf %60, %61 : vector<16x16xf32>
    %63 = arith.addf %62, %1 : vector<16x16xf32>
    %cst_22 = arith.constant dense<0xFF800000> : vector<16xf32>
    %64 = vector.multi_reduction <maximumf>, %63, %cst_22 [1] : vector<16x16xf32> to vector<16xf32>
    %65 = vector.shape_cast %64 : vector<16xf32> to vector<16x1xf32>
    %66 = vector.broadcast %65 : vector<16x1xf32> to vector<16x16xf32>
    %67 = arith.subf %63, %66 : vector<16x16xf32>
    %68 = math.exp %67 : vector<16x16xf32>
    %cst_23 = arith.constant dense<0.000000e+00> : vector<16xf32>
    %69 = vector.multi_reduction <add>, %68, %cst_23 [1] : vector<16x16xf32> to vector<16xf32>
    %70 = vector.shape_cast %69 : vector<16xf32> to vector<16x1xf32>
    %71 = tpu.reciprocal %70 {approx = true} : vector<16x1xf32> -> vector<16x1xf32>
    %72 = vector.broadcast %71 : vector<16x1xf32> to vector<16x16xf32>
    %73 = arith.mulf %68, %72 : vector<16x16xf32>
    %74 = arith.truncf %73 : vector<16x16xf32> to vector<16x16xbf16>
    %75 = vector.extract_strided_slice %38 {offsets = [0, 16], sizes = [16, 16], strides = [1, 1]} : vector<16x32xbf16> to vector<16x16xbf16>
    %cst_24 = arith.constant dense<0.000000e+00> : vector<16x16xf32>
    %76 = tpu.matmul %74, %75, %cst_24 {dimension_numbers = #tpu.dot_dimension_numbers<[1], [0], [0], [1], [0, 0, 1, 1], [], []>} : vector<16x16xbf16>, vector<16x16xbf16>, vector<16x16xf32> -> vector<16x16xf32>
    %77 = tpu.concatenate %57, %76 in 1 : vector<16x16xf32>, vector<16x16xf32> -> vector<16x32xf32>
    %c64 = arith.constant 64 : index
    %c0_25 = arith.constant 0 : index
    %78 = vector.load %arg1[%c64, %c0_25] : memref<320x128xbf16, #tpu.memory_space<vmem>>, vector<32x32xbf16>
    %c64_26 = arith.constant 64 : index
    %c32_27 = arith.constant 32 : index
    %79 = vector.load %arg1[%c64_26, %c32_27] : memref<320x128xbf16, #tpu.memory_space<vmem>>, vector<32x64xbf16>
    %c128 = arith.constant 128 : index
    %c0_28 = arith.constant 0 : index
    %80 = vector.load %arg1[%c128, %c0_28] : memref<320x128xbf16, #tpu.memory_space<vmem>>, vector<64x32xbf16>
    %c1 = arith.constant 1 : index
    %c0_29 = arith.constant 0 : index
    %81 = vector.load %arg2[%c1, %c0_29] : memref<16x128xf32, #tpu.memory_space<vmem>>, vector<1x128xf32>
    %c3 = arith.constant 3 : index
    %c0_30 = arith.constant 0 : index
    %82 = vector.load %arg2[%c3, %c0_30] : memref<16x128xf32, #tpu.memory_space<vmem>>, vector<1x128xf32>
    %83 = vector.extract_strided_slice %81 {offsets = [0, 0], sizes = [1, 32], strides = [1, 1]} : vector<1x128xf32> to vector<1x32xf32>
    %84 = arith.truncf %77 : vector<16x32xf32> to vector<16x32xbf16>
    %cst_31 = arith.constant dense<0.000000e+00> : vector<16x32xf32>
    %85 = tpu.matmul %84, %78, %cst_31 {dimension_numbers = #tpu.dot_dimension_numbers<[1], [0], [0], [1], [0, 0, 1, 1], [], []>} : vector<16x32xbf16>, vector<32x32xbf16>, vector<16x32xf32> -> vector<16x32xf32>
    %86 = vector.broadcast %83 : vector<1x32xf32> to vector<16x32xf32>
    %87 = arith.addf %85, %86 : vector<16x32xf32>
    %88 = arith.addf %87, %26 : vector<16x32xf32>
    %89 = vector.extract_strided_slice %82 {offsets = [0, 0], sizes = [1, 32], strides = [1, 1]} : vector<1x128xf32> to vector<1x32xf32>
    %90 = vector.extract_strided_slice %82 {offsets = [0, 32], sizes = [1, 32], strides = [1, 1]} : vector<1x128xf32> to vector<1x32xf32>
    %cst_32 = arith.constant dense<0.000000e+00> : vector<16xf32>
    %91 = vector.multi_reduction <add>, %88, %cst_32 [1] : vector<16x32xf32> to vector<16xf32>
    %92 = vector.shape_cast %91 : vector<16xf32> to vector<16x1xf32>
    %cst_33 = arith.constant 3.200000e+01 : f32
    %93 = vector.broadcast %cst_33 : f32 to vector<16x1xf32>
    %94 = arith.divf %92, %93 : vector<16x1xf32>
    %95 = vector.broadcast %94 : vector<16x1xf32> to vector<16x32xf32>
    %96 = arith.subf %88, %95 : vector<16x32xf32>
    %97 = arith.mulf %96, %96 : vector<16x32xf32>
    %cst_34 = arith.constant dense<0.000000e+00> : vector<16xf32>
    %98 = vector.multi_reduction <add>, %97, %cst_34 [1] : vector<16x32xf32> to vector<16xf32>
    %99 = vector.shape_cast %98 : vector<16xf32> to vector<16x1xf32>
    %cst_35 = arith.constant 3.200000e+01 : f32
    %100 = vector.broadcast %cst_35 : f32 to vector<16x1xf32>
    %101 = arith.divf %99, %100 : vector<16x1xf32>
    %102 = vector.broadcast %94 : vector<16x1xf32> to vector<16x32xf32>
    %103 = arith.subf %88, %102 : vector<16x32xf32>
    %cst_36 = arith.constant 9.99999974E-6 : f32
    %104 = vector.broadcast %cst_36 : f32 to vector<16x1xf32>
    %105 = arith.addf %101, %104 : vector<16x1xf32>
    %106 = math.rsqrt %105 : vector<16x1xf32>
    %107 = vector.broadcast %106 : vector<16x1xf32> to vector<16x32xf32>
    %108 = arith.mulf %103, %107 : vector<16x32xf32>
    %109 = vector.broadcast %89 : vector<1x32xf32> to vector<16x32xf32>
    %110 = arith.mulf %108, %109 : vector<16x32xf32>
    %111 = vector.broadcast %90 : vector<1x32xf32> to vector<16x32xf32>
    %112 = arith.addf %110, %111 : vector<16x32xf32>
    %113 = vector.extract_strided_slice %81 {offsets = [0, 32], sizes = [1, 64], strides = [1, 1]} : vector<1x128xf32> to vector<1x64xf32>
    %114 = arith.truncf %112 : vector<16x32xf32> to vector<16x32xbf16>
    %cst_37 = arith.constant dense<0.000000e+00> : vector<16x64xf32>
    %115 = tpu.matmul %114, %79, %cst_37 {dimension_numbers = #tpu.dot_dimension_numbers<[1], [0], [0], [1], [0, 0, 1, 1], [], []>} : vector<16x32xbf16>, vector<32x64xbf16>, vector<16x64xf32> -> vector<16x64xf32>
    %116 = vector.broadcast %113 : vector<1x64xf32> to vector<16x64xf32>
    %117 = arith.addf %115, %116 : vector<16x64xf32>
    %118 = arith.mulf %117, %117 : vector<16x64xf32>
    %119 = arith.mulf %117, %118 : vector<16x64xf32>
    %cst_38 = arith.constant 4.471500e-02 : f32
    %120 = vector.broadcast %cst_38 : f32 to vector<16x64xf32>
    %121 = arith.mulf %120, %119 : vector<16x64xf32>
    %122 = arith.addf %117, %121 : vector<16x64xf32>
    %cst_39 = arith.constant 0.797884583 : f32
    %123 = vector.broadcast %cst_39 : f32 to vector<16x64xf32>
    %124 = arith.mulf %123, %122 : vector<16x64xf32>
    %125 = math.tanh %124 : vector<16x64xf32>
    %cst_40 = arith.constant 1.000000e+00 : f32
    %126 = vector.broadcast %cst_40 : f32 to vector<16x64xf32>
    %127 = arith.addf %126, %125 : vector<16x64xf32>
    %cst_41 = arith.constant 5.000000e-01 : f32
    %128 = vector.broadcast %cst_41 : f32 to vector<16x64xf32>
    %129 = arith.mulf %128, %127 : vector<16x64xf32>
    %130 = arith.mulf %117, %129 : vector<16x64xf32>
    %131 = vector.extract_strided_slice %81 {offsets = [0, 96], sizes = [1, 32], strides = [1, 1]} : vector<1x128xf32> to vector<1x32xf32>
    %132 = arith.truncf %130 : vector<16x64xf32> to vector<16x64xbf16>
    %cst_42 = arith.constant dense<0.000000e+00> : vector<16x32xf32>
    %133 = tpu.matmul %132, %80, %cst_42 {dimension_numbers = #tpu.dot_dimension_numbers<[1], [0], [0], [1], [0, 0, 1, 1], [], []>} : vector<16x64xbf16>, vector<64x32xbf16>, vector<16x32xf32> -> vector<16x32xf32>
    %134 = vector.broadcast %131 : vector<1x32xf32> to vector<16x32xf32>
    %135 = arith.addf %133, %134 : vector<16x32xf32>
    %136 = arith.addf %135, %112 : vector<16x32xf32>
    %137 = vector.extract_strided_slice %82 {offsets = [0, 64], sizes = [1, 32], strides = [1, 1]} : vector<1x128xf32> to vector<1x32xf32>
    %138 = vector.extract_strided_slice %82 {offsets = [0, 96], sizes = [1, 32], strides = [1, 1]} : vector<1x128xf32> to vector<1x32xf32>
    %cst_43 = arith.constant dense<0.000000e+00> : vector<16xf32>
    %139 = vector.multi_reduction <add>, %136, %cst_43 [1] : vector<16x32xf32> to vector<16xf32>
    %140 = vector.shape_cast %139 : vector<16xf32> to vector<16x1xf32>
    %cst_44 = arith.constant 3.200000e+01 : f32
    %141 = vector.broadcast %cst_44 : f32 to vector<16x1xf32>
    %142 = arith.divf %140, %141 : vector<16x1xf32>
    %143 = vector.broadcast %142 : vector<16x1xf32> to vector<16x32xf32>
    %144 = arith.subf %136, %143 : vector<16x32xf32>
    %145 = arith.mulf %144, %144 : vector<16x32xf32>
    %cst_45 = arith.constant dense<0.000000e+00> : vector<16xf32>
    %146 = vector.multi_reduction <add>, %145, %cst_45 [1] : vector<16x32xf32> to vector<16xf32>
    %147 = vector.shape_cast %146 : vector<16xf32> to vector<16x1xf32>
    %cst_46 = arith.constant 3.200000e+01 : f32
    %148 = vector.broadcast %cst_46 : f32 to vector<16x1xf32>
    %149 = arith.divf %147, %148 : vector<16x1xf32>
    %150 = vector.broadcast %142 : vector<16x1xf32> to vector<16x32xf32>
    %151 = arith.subf %136, %150 : vector<16x32xf32>
    %cst_47 = arith.constant 9.99999974E-6 : f32
    %152 = vector.broadcast %cst_47 : f32 to vector<16x1xf32>
    %153 = arith.addf %149, %152 : vector<16x1xf32>
    %154 = math.rsqrt %153 : vector<16x1xf32>
    %155 = vector.broadcast %154 : vector<16x1xf32> to vector<16x32xf32>
    %156 = arith.mulf %151, %155 : vector<16x32xf32>
    %157 = vector.broadcast %137 : vector<1x32xf32> to vector<16x32xf32>
    %158 = arith.mulf %156, %157 : vector<16x32xf32>
    %159 = vector.broadcast %138 : vector<1x32xf32> to vector<16x32xf32>
    %160 = arith.addf %158, %159 : vector<16x32xf32>
    %c32_48 = arith.constant 32 : index
    %c0_49 = arith.constant 0 : index
    %161 = vector.load %arg1[%c32_48, %c0_49] : memref<320x128xbf16, #tpu.memory_space<vmem>>, vector<32x128xbf16>
    %c6 = arith.constant 6 : index
    %c0_50 = arith.constant 0 : index
    %162 = vector.load %arg2[%c6, %c0_50] : memref<16x128xf32, #tpu.memory_space<vmem>>, vector<1x128xf32>
    %163 = arith.truncf %160 : vector<16x32xf32> to vector<16x32xbf16>
    %cst_51 = arith.constant dense<0.000000e+00> : vector<16x128xf32>
    %164 = tpu.matmul %163, %161, %cst_51 {dimension_numbers = #tpu.dot_dimension_numbers<[1], [0], [0], [1], [0, 0, 1, 1], [], []>} : vector<16x32xbf16>, vector<32x128xbf16>, vector<16x128xf32> -> vector<16x128xf32>
    %165 = vector.broadcast %162 : vector<1x128xf32> to vector<16x128xf32>
    %166 = arith.addf %164, %165 : vector<16x128xf32>
    %167 = vector.extract_strided_slice %166 {offsets = [0, 0], sizes = [16, 32], strides = [1, 1]} : vector<16x128xf32> to vector<16x32xf32>
    %168 = arith.truncf %167 : vector<16x32xf32> to vector<16x32xbf16>
    %169 = vector.extract_strided_slice %166 {offsets = [0, 32], sizes = [16, 32], strides = [1, 1]} : vector<16x128xf32> to vector<16x32xf32>
    %170 = arith.truncf %169 : vector<16x32xf32> to vector<16x32xbf16>
    %171 = vector.extract_strided_slice %166 {offsets = [0, 64], sizes = [16, 32], strides = [1, 1]} : vector<16x128xf32> to vector<16x32xf32>
    %172 = arith.truncf %171 : vector<16x32xf32> to vector<16x32xbf16>
    %173 = vector.extract_strided_slice %168 {offsets = [0, 0], sizes = [16, 16], strides = [1, 1]} : vector<16x32xbf16> to vector<16x16xbf16>
    %174 = vector.extract_strided_slice %170 {offsets = [0, 0], sizes = [16, 16], strides = [1, 1]} : vector<16x32xbf16> to vector<16x16xbf16>
    %cst_52 = arith.constant dense<0.000000e+00> : vector<16x16xf32>
    %175 = tpu.matmul %173, %174, %cst_52 {dimension_numbers = #tpu.dot_dimension_numbers<[1], [1], [0], [0], [0, 0, 1, 0], [], []>} : vector<16x16xbf16>, vector<16x16xbf16>, vector<16x16xf32> -> vector<16x16xf32>
    %cst_53 = arith.constant 2.500000e-01 : f32
    %176 = vector.broadcast %cst_53 : f32 to vector<16x16xf32>
    %177 = arith.mulf %175, %176 : vector<16x16xf32>
    %178 = arith.addf %177, %1 : vector<16x16xf32>
    %cst_54 = arith.constant dense<0xFF800000> : vector<16xf32>
    %179 = vector.multi_reduction <maximumf>, %178, %cst_54 [1] : vector<16x16xf32> to vector<16xf32>
    %180 = vector.shape_cast %179 : vector<16xf32> to vector<16x1xf32>
    %181 = vector.broadcast %180 : vector<16x1xf32> to vector<16x16xf32>
    %182 = arith.subf %178, %181 : vector<16x16xf32>
    %183 = math.exp %182 : vector<16x16xf32>
    %cst_55 = arith.constant dense<0.000000e+00> : vector<16xf32>
    %184 = vector.multi_reduction <add>, %183, %cst_55 [1] : vector<16x16xf32> to vector<16xf32>
    %185 = vector.shape_cast %184 : vector<16xf32> to vector<16x1xf32>
    %186 = tpu.reciprocal %185 {approx = true} : vector<16x1xf32> -> vector<16x1xf32>
    %187 = vector.broadcast %186 : vector<16x1xf32> to vector<16x16xf32>
    %188 = arith.mulf %183, %187 : vector<16x16xf32>
    %189 = arith.truncf %188 : vector<16x16xf32> to vector<16x16xbf16>
    %190 = vector.extract_strided_slice %172 {offsets = [0, 0], sizes = [16, 16], strides = [1, 1]} : vector<16x32xbf16> to vector<16x16xbf16>
    %cst_56 = arith.constant dense<0.000000e+00> : vector<16x16xf32>
    %191 = tpu.matmul %189, %190, %cst_56 {dimension_numbers = #tpu.dot_dimension_numbers<[1], [0], [0], [1], [0, 0, 1, 1], [], []>} : vector<16x16xbf16>, vector<16x16xbf16>, vector<16x16xf32> -> vector<16x16xf32>
    %192 = vector.extract_strided_slice %168 {offsets = [0, 16], sizes = [16, 16], strides = [1, 1]} : vector<16x32xbf16> to vector<16x16xbf16>
    %193 = vector.extract_strided_slice %170 {offsets = [0, 16], sizes = [16, 16], strides = [1, 1]} : vector<16x32xbf16> to vector<16x16xbf16>
    %cst_57 = arith.constant dense<0.000000e+00> : vector<16x16xf32>
    %194 = tpu.matmul %192, %193, %cst_57 {dimension_numbers = #tpu.dot_dimension_numbers<[1], [1], [0], [0], [0, 0, 1, 0], [], []>} : vector<16x16xbf16>, vector<16x16xbf16>, vector<16x16xf32> -> vector<16x16xf32>
    %cst_58 = arith.constant 2.500000e-01 : f32
    %195 = vector.broadcast %cst_58 : f32 to vector<16x16xf32>
    %196 = arith.mulf %194, %195 : vector<16x16xf32>
    %197 = arith.addf %196, %1 : vector<16x16xf32>
    %cst_59 = arith.constant dense<0xFF800000> : vector<16xf32>
    %198 = vector.multi_reduction <maximumf>, %197, %cst_59 [1] : vector<16x16xf32> to vector<16xf32>
    %199 = vector.shape_cast %198 : vector<16xf32> to vector<16x1xf32>
    %200 = vector.broadcast %199 : vector<16x1xf32> to vector<16x16xf32>
    %201 = arith.subf %197, %200 : vector<16x16xf32>
    %202 = math.exp %201 : vector<16x16xf32>
    %cst_60 = arith.constant dense<0.000000e+00> : vector<16xf32>
    %203 = vector.multi_reduction <add>, %202, %cst_60 [1] : vector<16x16xf32> to vector<16xf32>
    %204 = vector.shape_cast %203 : vector<16xf32> to vector<16x1xf32>
    %205 = tpu.reciprocal %204 {approx = true} : vector<16x1xf32> -> vector<16x1xf32>
    %206 = vector.broadcast %205 : vector<16x1xf32> to vector<16x16xf32>
    %207 = arith.mulf %202, %206 : vector<16x16xf32>
    %208 = arith.truncf %207 : vector<16x16xf32> to vector<16x16xbf16>
    %209 = vector.extract_strided_slice %172 {offsets = [0, 16], sizes = [16, 16], strides = [1, 1]} : vector<16x32xbf16> to vector<16x16xbf16>
    %cst_61 = arith.constant dense<0.000000e+00> : vector<16x16xf32>
    %210 = tpu.matmul %208, %209, %cst_61 {dimension_numbers = #tpu.dot_dimension_numbers<[1], [0], [0], [1], [0, 0, 1, 1], [], []>} : vector<16x16xbf16>, vector<16x16xbf16>, vector<16x16xf32> -> vector<16x16xf32>
    %211 = tpu.concatenate %191, %210 in 1 : vector<16x16xf32>, vector<16x16xf32> -> vector<16x32xf32>
    %c96 = arith.constant 96 : index
    %c0_62 = arith.constant 0 : index
    %212 = vector.load %arg1[%c96, %c0_62] : memref<320x128xbf16, #tpu.memory_space<vmem>>, vector<32x32xbf16>
    %c96_63 = arith.constant 96 : index
    %c32_64 = arith.constant 32 : index
    %213 = vector.load %arg1[%c96_63, %c32_64] : memref<320x128xbf16, #tpu.memory_space<vmem>>, vector<32x64xbf16>
    %c192 = arith.constant 192 : index
    %c0_65 = arith.constant 0 : index
    %214 = vector.load %arg1[%c192, %c0_65] : memref<320x128xbf16, #tpu.memory_space<vmem>>, vector<64x32xbf16>
    %c2 = arith.constant 2 : index
    %c0_66 = arith.constant 0 : index
    %215 = vector.load %arg2[%c2, %c0_66] : memref<16x128xf32, #tpu.memory_space<vmem>>, vector<1x128xf32>
    %c4 = arith.constant 4 : index
    %c0_67 = arith.constant 0 : index
    %216 = vector.load %arg2[%c4, %c0_67] : memref<16x128xf32, #tpu.memory_space<vmem>>, vector<1x128xf32>
    %217 = vector.extract_strided_slice %215 {offsets = [0, 0], sizes = [1, 32], strides = [1, 1]} : vector<1x128xf32> to vector<1x32xf32>
    %218 = arith.truncf %211 : vector<16x32xf32> to vector<16x32xbf16>
    %cst_68 = arith.constant dense<0.000000e+00> : vector<16x32xf32>
    %219 = tpu.matmul %218, %212, %cst_68 {dimension_numbers = #tpu.dot_dimension_numbers<[1], [0], [0], [1], [0, 0, 1, 1], [], []>} : vector<16x32xbf16>, vector<32x32xbf16>, vector<16x32xf32> -> vector<16x32xf32>
    %220 = vector.broadcast %217 : vector<1x32xf32> to vector<16x32xf32>
    %221 = arith.addf %219, %220 : vector<16x32xf32>
    %222 = arith.addf %221, %160 : vector<16x32xf32>
    %223 = vector.extract_strided_slice %216 {offsets = [0, 0], sizes = [1, 32], strides = [1, 1]} : vector<1x128xf32> to vector<1x32xf32>
    %224 = vector.extract_strided_slice %216 {offsets = [0, 32], sizes = [1, 32], strides = [1, 1]} : vector<1x128xf32> to vector<1x32xf32>
    %cst_69 = arith.constant dense<0.000000e+00> : vector<16xf32>
    %225 = vector.multi_reduction <add>, %222, %cst_69 [1] : vector<16x32xf32> to vector<16xf32>
    %226 = vector.shape_cast %225 : vector<16xf32> to vector<16x1xf32>
    %cst_70 = arith.constant 3.200000e+01 : f32
    %227 = vector.broadcast %cst_70 : f32 to vector<16x1xf32>
    %228 = arith.divf %226, %227 : vector<16x1xf32>
    %229 = vector.broadcast %228 : vector<16x1xf32> to vector<16x32xf32>
    %230 = arith.subf %222, %229 : vector<16x32xf32>
    %231 = arith.mulf %230, %230 : vector<16x32xf32>
    %cst_71 = arith.constant dense<0.000000e+00> : vector<16xf32>
    %232 = vector.multi_reduction <add>, %231, %cst_71 [1] : vector<16x32xf32> to vector<16xf32>
    %233 = vector.shape_cast %232 : vector<16xf32> to vector<16x1xf32>
    %cst_72 = arith.constant 3.200000e+01 : f32
    %234 = vector.broadcast %cst_72 : f32 to vector<16x1xf32>
    %235 = arith.divf %233, %234 : vector<16x1xf32>
    %236 = vector.broadcast %228 : vector<16x1xf32> to vector<16x32xf32>
    %237 = arith.subf %222, %236 : vector<16x32xf32>
    %cst_73 = arith.constant 9.99999974E-6 : f32
    %238 = vector.broadcast %cst_73 : f32 to vector<16x1xf32>
    %239 = arith.addf %235, %238 : vector<16x1xf32>
    %240 = math.rsqrt %239 : vector<16x1xf32>
    %241 = vector.broadcast %240 : vector<16x1xf32> to vector<16x32xf32>
    %242 = arith.mulf %237, %241 : vector<16x32xf32>
    %243 = vector.broadcast %223 : vector<1x32xf32> to vector<16x32xf32>
    %244 = arith.mulf %242, %243 : vector<16x32xf32>
    %245 = vector.broadcast %224 : vector<1x32xf32> to vector<16x32xf32>
    %246 = arith.addf %244, %245 : vector<16x32xf32>
    %247 = vector.extract_strided_slice %215 {offsets = [0, 32], sizes = [1, 64], strides = [1, 1]} : vector<1x128xf32> to vector<1x64xf32>
    %248 = arith.truncf %246 : vector<16x32xf32> to vector<16x32xbf16>
    %cst_74 = arith.constant dense<0.000000e+00> : vector<16x64xf32>
    %249 = tpu.matmul %248, %213, %cst_74 {dimension_numbers = #tpu.dot_dimension_numbers<[1], [0], [0], [1], [0, 0, 1, 1], [], []>} : vector<16x32xbf16>, vector<32x64xbf16>, vector<16x64xf32> -> vector<16x64xf32>
    %250 = vector.broadcast %247 : vector<1x64xf32> to vector<16x64xf32>
    %251 = arith.addf %249, %250 : vector<16x64xf32>
    %252 = arith.mulf %251, %251 : vector<16x64xf32>
    %253 = arith.mulf %251, %252 : vector<16x64xf32>
    %cst_75 = arith.constant 4.471500e-02 : f32
    %254 = vector.broadcast %cst_75 : f32 to vector<16x64xf32>
    %255 = arith.mulf %254, %253 : vector<16x64xf32>
    %256 = arith.addf %251, %255 : vector<16x64xf32>
    %cst_76 = arith.constant 0.797884583 : f32
    %257 = vector.broadcast %cst_76 : f32 to vector<16x64xf32>
    %258 = arith.mulf %257, %256 : vector<16x64xf32>
    %259 = math.tanh %258 : vector<16x64xf32>
    %cst_77 = arith.constant 1.000000e+00 : f32
    %260 = vector.broadcast %cst_77 : f32 to vector<16x64xf32>
    %261 = arith.addf %260, %259 : vector<16x64xf32>
    %cst_78 = arith.constant 5.000000e-01 : f32
    %262 = vector.broadcast %cst_78 : f32 to vector<16x64xf32>
    %263 = arith.mulf %262, %261 : vector<16x64xf32>
    %264 = arith.mulf %251, %263 : vector<16x64xf32>
    %265 = vector.extract_strided_slice %215 {offsets = [0, 96], sizes = [1, 32], strides = [1, 1]} : vector<1x128xf32> to vector<1x32xf32>
    %266 = arith.truncf %264 : vector<16x64xf32> to vector<16x64xbf16>
    %cst_79 = arith.constant dense<0.000000e+00> : vector<16x32xf32>
    %267 = tpu.matmul %266, %214, %cst_79 {dimension_numbers = #tpu.dot_dimension_numbers<[1], [0], [0], [1], [0, 0, 1, 1], [], []>} : vector<16x64xbf16>, vector<64x32xbf16>, vector<16x32xf32> -> vector<16x32xf32>
    %268 = vector.broadcast %265 : vector<1x32xf32> to vector<16x32xf32>
    %269 = arith.addf %267, %268 : vector<16x32xf32>
    %270 = arith.addf %269, %246 : vector<16x32xf32>
    %271 = vector.extract_strided_slice %216 {offsets = [0, 64], sizes = [1, 32], strides = [1, 1]} : vector<1x128xf32> to vector<1x32xf32>
    %272 = vector.extract_strided_slice %216 {offsets = [0, 96], sizes = [1, 32], strides = [1, 1]} : vector<1x128xf32> to vector<1x32xf32>
    %cst_80 = arith.constant dense<0.000000e+00> : vector<16xf32>
    %273 = vector.multi_reduction <add>, %270, %cst_80 [1] : vector<16x32xf32> to vector<16xf32>
    %274 = vector.shape_cast %273 : vector<16xf32> to vector<16x1xf32>
    %cst_81 = arith.constant 3.200000e+01 : f32
    %275 = vector.broadcast %cst_81 : f32 to vector<16x1xf32>
    %276 = arith.divf %274, %275 : vector<16x1xf32>
    %277 = vector.broadcast %276 : vector<16x1xf32> to vector<16x32xf32>
    %278 = arith.subf %270, %277 : vector<16x32xf32>
    %279 = arith.mulf %278, %278 : vector<16x32xf32>
    %cst_82 = arith.constant dense<0.000000e+00> : vector<16xf32>
    %280 = vector.multi_reduction <add>, %279, %cst_82 [1] : vector<16x32xf32> to vector<16xf32>
    %281 = vector.shape_cast %280 : vector<16xf32> to vector<16x1xf32>
    %cst_83 = arith.constant 3.200000e+01 : f32
    %282 = vector.broadcast %cst_83 : f32 to vector<16x1xf32>
    %283 = arith.divf %281, %282 : vector<16x1xf32>
    %284 = vector.broadcast %276 : vector<16x1xf32> to vector<16x32xf32>
    %285 = arith.subf %270, %284 : vector<16x32xf32>
    %cst_84 = arith.constant 9.99999974E-6 : f32
    %286 = vector.broadcast %cst_84 : f32 to vector<16x1xf32>
    %287 = arith.addf %283, %286 : vector<16x1xf32>
    %288 = math.rsqrt %287 : vector<16x1xf32>
    %289 = vector.broadcast %288 : vector<16x1xf32> to vector<16x32xf32>
    %290 = arith.mulf %285, %289 : vector<16x32xf32>
    %291 = vector.broadcast %271 : vector<1x32xf32> to vector<16x32xf32>
    %292 = arith.mulf %290, %291 : vector<16x32xf32>
    %293 = vector.broadcast %272 : vector<1x32xf32> to vector<16x32xf32>
    %294 = arith.addf %292, %293 : vector<16x32xf32>
    %295 = vector.extract_strided_slice %294 {offsets = [0, 0], sizes = [1, 32], strides = [1, 1]} : vector<16x32xf32> to vector<1x32xf32>
    %296 = vector.extract_strided_slice %294 {offsets = [8, 0], sizes = [1, 32], strides = [1, 1]} : vector<16x32xf32> to vector<1x32xf32>
    %297 = tpu.concatenate %295, %296 in 0 : vector<1x32xf32>, vector<1x32xf32> -> vector<2x32xf32>
    %c256 = arith.constant 256 : index
    %c0_85 = arith.constant 0 : index
    %298 = vector.load %arg1[%c256, %c0_85] : memref<320x128xbf16, #tpu.memory_space<vmem>>, vector<32x32xbf16>
    %c7 = arith.constant 7 : index
    %c0_86 = arith.constant 0 : index
    %299 = vector.load %arg2[%c7, %c0_86] : memref<16x128xf32, #tpu.memory_space<vmem>>, vector<1x32xf32>
    %c288 = arith.constant 288 : index
    %c0_87 = arith.constant 0 : index
    %300 = vector.load %arg1[%c288, %c0_87] : memref<320x128xbf16, #tpu.memory_space<vmem>>, vector<32x128xbf16>
    %c8 = arith.constant 8 : index
    %c0_88 = arith.constant 0 : index
    %301 = vector.load %arg2[%c8, %c0_88] : memref<16x128xf32, #tpu.memory_space<vmem>>, vector<1x128xf32>
    %302 = arith.truncf %297 : vector<2x32xf32> to vector<2x32xbf16>
    %cst_89 = arith.constant dense<0.000000e+00> : vector<2x32xf32>
    %303 = tpu.matmul %302, %298, %cst_89 {dimension_numbers = #tpu.dot_dimension_numbers<[1], [0], [0], [1], [0, 0, 1, 1], [], []>} : vector<2x32xbf16>, vector<32x32xbf16>, vector<2x32xf32> -> vector<2x32xf32>
    %304 = vector.broadcast %299 : vector<1x32xf32> to vector<2x32xf32>
    %305 = arith.addf %303, %304 : vector<2x32xf32>
    %306 = math.tanh %305 : vector<2x32xf32>
    %307 = arith.truncf %306 : vector<2x32xf32> to vector<2x32xbf16>
    %cst_90 = arith.constant dense<0.000000e+00> : vector<2x128xf32>
    %308 = tpu.matmul %307, %300, %cst_90 {dimension_numbers = #tpu.dot_dimension_numbers<[1], [0], [0], [1], [0, 0, 1, 1], [], []>} : vector<2x32xbf16>, vector<32x128xbf16>, vector<2x128xf32> -> vector<2x128xf32>
    %309 = vector.broadcast %301 : vector<1x128xf32> to vector<2x128xf32>
    %310 = arith.addf %308, %309 : vector<2x128xf32>
    %311 = vector.extract_strided_slice %310 {offsets = [0, 0], sizes = [2, 2], strides = [1, 1]} : vector<2x128xf32> to vector<2x2xf32>
    %cst_91 = arith.constant dense<0xFF800000> : vector<2xf32>
    %312 = vector.multi_reduction <maximumf>, %311, %cst_91 [1] : vector<2x2xf32> to vector<2xf32>
    %313 = vector.shape_cast %312 : vector<2xf32> to vector<2x1xf32>
    %314 = vector.broadcast %313 : vector<2x1xf32> to vector<2x2xf32>
    %315 = arith.subf %311, %314 : vector<2x2xf32>
    %316 = math.exp %315 : vector<2x2xf32>
    %cst_92 = arith.constant dense<0.000000e+00> : vector<2xf32>
    %317 = vector.multi_reduction <add>, %316, %cst_92 [1] : vector<2x2xf32> to vector<2xf32>
    %318 = vector.shape_cast %317 : vector<2xf32> to vector<2x1xf32>
    %319 = math.log %318 : vector<2x1xf32>
    %320 = arith.addf %313, %319 : vector<2x1xf32>
    %321 = arith.mulf %311, %2 : vector<2x2xf32>
    %cst_93 = arith.constant dense<0.000000e+00> : vector<2xf32>
    %322 = vector.multi_reduction <add>, %321, %cst_93 [1] : vector<2x2xf32> to vector<2xf32>
    %323 = vector.shape_cast %322 : vector<2xf32> to vector<2x1xf32>
    %324 = arith.subf %320, %323 : vector<2x1xf32>
    %325 = vector.shape_cast %324 : vector<2x1xf32> to vector<1x2x1xf32>
    %cst_94 = arith.constant dense<0.000000e+00> : vector<1xf32>
    %326 = vector.multi_reduction <add>, %325, %cst_94 [1, 2] : vector<1x2x1xf32> to vector<1xf32>
    %327 = vector.shape_cast %326 : vector<1xf32> to vector<1x1x1xf32>
    %328 = vector.extract %327[0, 0, 0] : f32 from vector<1x1x1xf32>
    %cst_95 = arith.constant 2.000000e+00 : f32
    %329 = arith.divf %328, %cst_95 : f32
    %330 = tpu.iota {dimensions = array<i32: 1>} : vector<2x128xi32>
    %c2_i32 = arith.constant 2 : i32
    %331 = vector.broadcast %c2_i32 : i32 to vector<2x128xi32>
    %332 = arith.cmpi eq, %330, %331 : vector<2x128xi32>
    %333 = vector.broadcast %329 : f32 to vector<2x128xf32>
    %334 = arith.select %332, %333, %310 : vector<2x128xi1>, vector<2x128xf32>
    %c0_96 = arith.constant 0 : index
    %c0_97 = arith.constant 0 : index
    %335 = vector.load %arg3[%c0_96, %c0_97] : memref<2x128xf32, #tpu.memory_space<vmem>>, vector<2x128xf32>
    tpu.vector_store %arg3[%c0_96, %c0_97], %334 {strides = array<i32>} : memref<2x128xf32, #tpu.memory_space<vmem>>, vector<2x128xf32>,
    return
  }
}

</mosaic_0001>

<bundles_post_ra>
// kernel: _lambda_.1
= control target key start
LH: loop header
LB: loop body
LE: loop exit
PB: predicated region body
PF: predicated region fallthrough
CT: control target
= control target key end

     0   :  { %vm19_vm0 = vcmask 261120   ;;  %s1839_s18 = smov 96   ;;  %v1840_v16 = vmov 0.0   ;;  %vm1841_vm1 = vmmov 0   ;;  %s1842_s25 = smov 80   ;;  %vm129_vm2 = vcmask 130048   ;;  %s2196_s0 = inlined_call_operand.vmem [shape: f32[16,128], index: 0, kind: input, shape index: {}]   ;;  %s2197_s2 = inlined_call_operand.vmem [shape: f32[16,128], index: 2, kind: input, shape index: {}]   ;;  %s2198_s1 = inlined_call_operand.vmem [shape: bf16[320,128], index: 1, kind: input, shape index: {}]   ;;  %s2199_s3 = inlined_call_operand.vmem [shape: f32[2,128], index: 3, kind: output, shape index: {}]  }
   0x1   :  { %v15_v0 = vld [vmem:[%s2196_s0] sm:$0xff]  ;;  %v1874_v1 = vld [vmem:[%s2196_s0 + $0x8] sm:$0xff]  ;;  %1596 = vmatprep.subr.bf16.mxu0 %v1840_v16  ;;  %1604 = vmatprep.subr.bf16.mxu1 %v1840_v16  ;;  %s1843_s26 = smov 112   ;;  %s1844_s27 = smov 48   ;;  %vm610_vm3 = vcmask 523264   ;;  %vm1320_vm4 = vcmask 1040384  }
   0x2   :  { %v20_v2 = vsel %vm19_vm0, %v15_v0, 0.0  ;;  %v23_v3 = vsel %vm19_vm0, %v1874_v1, 0.0  ;;  %v1499_v4 = vld [vmem:[%s2197_s2] ss:$0 sm:$0xff]  ;;  %v1754_v17 = vld [vmem:[%s2198_s1 + $0x8] sm:$0xff]   ;;  %1600 = vmatprep.mubr.msk.bf16.mxu0 %vm1841_vm1, %v1840_v16  ;;  %1606 = vmatprep.mubr.msk.bf16.mxu1 %vm1841_vm1, %v1840_v16  ;;  %s1845_s28 = smov 64  }
   0x3   :  { %21 = vadd.xlane.f32.xlu0 %v20_v2  ;;  %v1753_v15 = vld [vmem:[%s2198_s1] sm:$0xff]   ;;  %s1846_s6 = smov 16   ;;  %s1847_s20 = smov 32   ;;  %vm1453_vm5 = vcmask 9216   ;;  %vm1475_vm6 = vcmask 1024  }
   0x4   :  { %1597 = vmatpush3.bf16.msra.mxu0 %v1753_v15  ;;  %v1500_v34 = vld [vmem:[%s2197_s2 + $0x5] ss:$0 sm:$0xff] }
   0x5   :  { %1598 = vmatprep.subr.bf16.mxu0 %v1840_v16 }
   0x7   :  { %24 = vadd.xlane.f32.xlu0 %v23_v3 }
   0x8   :  { %1599 = vmatpush3.bf16.msra.mxu0 %v1754_v17 }
   0x9   :  { %1610 = vmatprep.subr.bf16.mxu0 %v1840_v16 }
  0x1d   :  { %54 = vrot.lane.b32.xlu0 %v1499_v4, %s1839_s18 }
  0x21   :  { %181 = vrot.lane.b32.xlu0 %v15_v0, %s1839_s18 }
  0x90   :  { %v22_v5 = vpop.xlane.xlu0 %21 }
  0x91   :  { %v27_v6 = vmul.f32 0.03125, %v22_v5 }
  0x93   :  { %v29_v7 = vsub.f32 %v15_v0, %v27_v6 }
  0x94   :  { %v25_v8 = vpop.xlane.xlu0 %24 }
  0x95   :  { %v28_v9 = vmul.f32 0.03125, %v25_v8  ;;  %v31_v10 = vmul.f32 %v29_v7, %v29_v7 }
  0x97   :  { %v30_v11 = vsub.f32 %v1874_v1, %v28_v9  ;;  %v33_v12 = vsel %vm19_vm0, %v31_v10, 0.0 }
  0x98   :  { %34 = vadd.xlane.f32.xlu1 %v33_v12  ;;  %v55_v29 = vpop.permute.xlu0 %54 }
  0x99   :  { %v32_v13 = vmul.f32 %v30_v11, %v30_v11 }
  0x9b   :  { %v36_v14 = vsel %vm19_vm0, %v32_v13, 0.0 }
  0x9c   :  { %37 = vadd.xlane.f32.xlu1 %v36_v14  ;;  %v1934_v48 = vpop.permute.xlu0 %181 }
 0x125   :  { %v35_v18 = vpop.xlane.xlu1 %34 }
 0x126   :  { %v39_v19 = vmul.f32 0.03125, %v35_v18 }
 0x128   :  { %v41_v20 = vadd.f32 1e-05, %v39_v19 }
 0x129   :  { %v38_v21 = vpop.xlane.xlu1 %37 }
 0x12a   :  { %1773 = vrsqrt.f32 %v41_v20  ;;  %v40_v22 = vmul.f32 0.03125, %v38_v21 }
 0x12c   :  { %v42_v23 = vadd.f32 1e-05, %v40_v22 }
 0x12e   :  { %1775 = vrsqrt.f32 %v42_v23 }
 0x134   :  { %v1774_v24 = vpop.eup %1773 }
 0x135   :  { %v45_v25 = vmul.f32 %v1774_v24, %v29_v7 }
 0x137   :  { %v51_v28 = vmul.f32 %v1499_v4, %v45_v25 }
 0x138   :  { %v1776_v26 = vpop.eup %1775 }
 0x139   :  { %v46_v27 = vmul.f32 %v1776_v26, %v30_v11  ;;  %v1901_v31 = vadd.f32 %v55_v29, %v51_v28 }
 0x13b   :  { %v52_v30 = vmul.f32 %v1499_v4, %v46_v27 }
 0x13d   :  { %v1903_v32 = vadd.f32 %v55_v29, %v52_v30 }
 0x13f   :  { %v64_v33 = vpack.c.bf16 %v1903_v32, %v1901_v31 }
 0x141   :  { %1601 = vmatmul.mubr.msk.bf16.vlgmr.msra.gmra.mrb[0].mxu0 %vm19_vm0, %v64_v33 }
 0x142   :  { %1612 = vmatprep.mubr.msk.bf16.mxu0 %vm1841_vm1, %v1840_v16 }
 0x214   :  { %v118_v35 = vpop.f32.mrb[0].mxu0 }
 0x215   :  { %v1602_v36 = vpop.f32.mrb[1].mxu0  ;;  %v119_v38 = vadd.f32 %v1500_v34, %v118_v35 }
 0x216   :  { %v121_v37 = vpop.f32.mrb[2].mxu0 }
 0x217   :  { %v122_v39 = vadd.f32 %v1500_v34, %v121_v37  ;;  %v1603_v40 = vpop.f32.mrb[3].mxu0 }
 0x219   :  { %v1913_v41 = vpack.c.bf16 %v122_v39, %v119_v38 }
 0x21b   :  { %127 = vrot.lane.b32.xlu1 %v1913_v41, %s1839_s18 }
 0x21f   :  { %261 = vrot.lane.b32.xlu1 %v1913_v41, %s1842_s25 }
 0x223   :  { %259 = vrot.lane.b32.xlu1 %v1913_v41, %s1843_s26 }
 0x227   :  { %183 = vrot.lane.b32.xlu1 %v1874_v1, %s1839_s18 }
 0x28d   :  { %v128_v42 = vpop.permute.xlu1 %127 }
 0x28e   :  { %v134_v43 = vsel %vm129_vm2, %v128_v42, 0 }
 0x28f   :  { %1605 = vmatpush3.bf16.xpose.msra.mxu1 %v134_v43 }
 0x290   :  { %1616 = vmatprep.subr.bf16.mxu1 %v1840_v16 }
 0x291   :  { %v262_v44 = vpop.permute.xlu1 %261 }
 0x292   :  { %v267_v45 = vsel %vm129_vm2, %v262_v44, 0  ;;  %v1755_v44 = vld [vmem:[%s2198_s1 + $0x20] sm:$0xff]  }
 0x295   :  { %v260_v46 = vpop.permute.xlu1 %259 }
 0x296   :  { %1607 = vmatmul.mubr.msk.bf16.vlgmr.msra.gmra.mrb[0].mxu1 %vm129_vm2, %v1913_v41 }
 0x297   :  { %1617 = vmatpush3.bf16.xpose.msra.mxu1 %v267_v45  ;;  %1618 = vmatprep.mubr.msk.bf16.mxu1 %vm1841_vm1, %v1840_v16 }
 0x298   :  { %1628 = vmatprep.subr.bf16.mxu1 %v1840_v16 }
 0x299   :  { %v1936_v52 = vpop.permute.xlu1 %183 }
 0x29e   :  { %1619 = vmatmul.mubr.msk.bf16.vlgmr.msra.gmra.mrb[4].mxu1 %vm129_vm2, %v260_v46 }
 0x29f   :  { %1632 = vmatprep.mubr.msk.bf16.mxu1 %vm1841_vm1, %v1840_v16  ;;  %1629 = vmatpush3.bf16.msra.mxu1 %v1755_v44 }
 0x2a0   :  { %1630 = vmatprep.subr.bf16.mxu1 %v1840_v16 }
 0x369   :  { %v170_v47 = vpop.f32.mrb[0].mxu1 }
 0x36a   :  { %v177_v49 = vmul.f32 0.25, %v170_v47  ;;  %v1608_v50 = vpop.f32.mrb[1].mxu1 }
 0x36b   :  { %v173_v51 = vpop.f32.mrb[2].mxu1  ;;  %v1756_v50 = vld [vmem:[%s2198_s1 + $0x28] sm:$0xff]  }
 0x36c   :  { %v178_v53 = vmul.f32 0.25, %v173_v51  ;;  %v1609_v54 = vpop.f32.mrb[3].mxu1  ;;  %v187_v55 = vadd.f32 %v1934_v48, %v177_v49  ;;  %1631 = vmatpush3.bf16.msra.mxu1 %v1756_v50 }
 0x36d   :  { %1644 = vmatprep.subr.bf16.mxu1 %v1840_v16 }
 0x36e   :  { %v189_v56 = vsel %vm129_vm2, %v187_v55, -inf  ;;  %v188_v57 = vadd.f32 %v1936_v52, %v178_v53 }
 0x36f   :  { %190 = vmax.xlane.f32.xlu0 %v189_v56 }
 0x370   :  { %v192_v58 = vsel %vm129_vm2, %v188_v57, -inf }
 0x371   :  { %v303_v59 = vpop.f32.mrb[4].mxu1  ;;  %193 = vmax.xlane.f32.xlu1 %v192_v58 }
 0x372   :  { %v310_v60 = vmul.f32 0.25, %v303_v59  ;;  %v1620_v61 = vpop.f32.mrb[5].mxu1 }
 0x373   :  { %v306_v62 = vpop.f32.mrb[6].mxu1 }
 0x374   :  { %v311_v63 = vmul.f32 0.25, %v306_v62  ;;  %v1621_v0 = vpop.f32.mrb[7].mxu1  ;;  %v312_v1 = vadd.f32 %v310_v60, %v1934_v48 }
 0x376   :  { %v314_v2 = vsel %vm129_vm2, %v312_v1, -inf  ;;  %v313_v3 = vadd.f32 %v311_v63, %v1936_v52  ;;  %v1979_v63 = vld [vmem:[%s2197_s2 + $0x1] ss:$0 sm:$0xff] }
 0x377   :  { %315 = vmax.xlane.f32.xlu0 %v314_v2 }
 0x378   :  { %v317_v4 = vsel %vm129_vm2, %v313_v3, -inf }
 0x37b   :  { %318 = vmax.xlane.f32.xlu0 %v317_v4 }
 0x3fc   :  { %v191_v5 = vpop.xlane.xlu0 %190 }
 0x3fd   :  { %v195_v6 = vsub.f32 %v187_v55, %v191_v5 }
 0x3fe   :  { %v194_v7 = vpop.xlane.xlu1 %193 }
 0x3ff   :  { %v197_v8 = vmul.f32 1.442695, %v195_v6  ;;  %v196_v9 = vsub.f32 %v188_v57, %v194_v7 }
 0x401   :  { %1777 = vpow2.f32 %v197_v8  ;;  %v199_v10 = vmul.f32 1.442695, %v196_v9 }
 0x403   :  { %1779 = vpow2.f32 %v199_v10 }
 0x404   :  { %v316_v11 = vpop.xlane.xlu0 %315 }
 0x405   :  { %v320_v12 = vsub.f32 %v312_v1, %v316_v11 }
 0x407   :  { %v322_v13 = vmul.f32 1.442695, %v320_v12 }
 0x408   :  { %v319_v14 = vpop.xlane.xlu0 %318 }
 0x409   :  { %1781 = vpow2.f32 %v322_v13  ;;  %v321_v15 = vsub.f32 %v313_v3, %v319_v14 }
 0x40b   :  { %v1778_v17 = vpop.eup %1777  ;;  %v324_v18 = vmul.f32 1.442695, %v321_v15 }
 0x40c   :  { %v201_v19 = vsel %vm129_vm2, %v1778_v17, 0.0 }
 0x40d   :  { %v1780_v20 = vpop.eup %1779  ;;  %1783 = vpow2.f32 %v324_v18  ;;  %202 = vadd.xlane.f32.xlu0 %v201_v19  ;;  %v1996_v19 = vld [vmem:[%s2197_s2 + $0x3] ss:$0 sm:$0xff] }
 0x40e   :  { %v204_v21 = vsel %vm129_vm2, %v1780_v20, 0.0 }
 0x40f   :  { %205 = vadd.xlane.f32.xlu1 %v204_v21 }
 0x413   :  { %v1782_v22 = vpop.eup %1781 }
 0x414   :  { %v326_v23 = vsel %vm129_vm2, %v1782_v22, 0.0 }
 0x415   :  { %327 = vadd.xlane.f32.xlu0 %v326_v23 }
 0x417   :  { %v1784_v24 = vpop.eup %1783 }
 0x418   :  { %v329_v25 = vsel %vm129_vm2, %v1784_v24, 0.0 }
 0x419   :  { %330 = vadd.xlane.f32.xlu1 %v329_v25 }
 0x42a   :  { %337 = vrot.lane.b32.xlu1 %v1913_v41, %s1844_s27 }
 0x42b   :  { %212 = vrot.lane.b32.xlu0 %v1913_v41, %s1845_s28 }
 0x49a   :  { %v203_v26 = vpop.xlane.xlu0 %202 }
 0x49b   :  { %1785 = vrcp.f32 %v203_v26 }
 0x49c   :  { %v206_v27 = vpop.xlane.xlu1 %205 }
 0x49d   :  { %1787 = vrcp.f32 %v206_v27 }
 0x4a2   :  { %v328_v28 = vpop.xlane.xlu0 %327 }
 0x4a3   :  { %1789 = vrcp.f32 %v328_v28 }
 0x4a5   :  { %v1786_v29 = vpop.eup %1785 }
 0x4a6   :  { %v331_v30 = vpop.xlane.xlu1 %330  ;;  %v213_v33 = vpop.permute.xlu0 %212  ;;  %v209_v35 = vmul.f32 %v1786_v29, %v1778_v17 }
 0x4a7   :  { %v1788_v34 = vpop.eup %1787  ;;  %1791 = vrcp.f32 %v331_v30  ;;  %1611 = vmatpush3.bf16.msra.mxu0 %v213_v33 }
 0x4a8   :  { %v210_v36 = vmul.f32 %v1788_v34, %v1780_v20  ;;  %1622 = vmatprep.subr.bf16.mxu0 %v1840_v16 }
 0x4aa   :  { %v338_v37 = vpop.permute.xlu1 %337  ;;  %v211_v38 = vpack.c.bf16 %v210_v36, %v209_v35 }
 0x4ac   :  { %1613 = vmatmul.mubr.msk.bf16.vlgmr.msra.gmra.mrb[4].mxu0 %vm129_vm2, %v211_v38 }
 0x4ad   :  { %1623 = vmatpush3.bf16.msra.mxu0 %v338_v37  ;;  %1624 = vmatprep.mubr.msk.bf16.mxu0 %vm1841_vm1, %v1840_v16  ;;  %v1790_v39 = vpop.eup %1789 }
 0x4ae   :  { %1636 = vmatprep.subr.bf16.mxu0 %v1840_v16  ;;  %v334_v41 = vmul.f32 %v1790_v39, %v1782_v22 }
 0x4b1   :  { %v1792_v40 = vpop.eup %1791 }
 0x4b2   :  { %v335_v42 = vmul.f32 %v1792_v40, %v1784_v24  ;;  %v1757_v40 = vld [vmem:[%s2198_s1 + $0x40] sm:$0xff]  }
 0x4b4   :  { %v336_v43 = vpack.c.bf16 %v335_v42, %v334_v41  ;;  %v1758_v41 = vld [vmem:[%s2198_s1 + $0x48] sm:$0xff]   ;;  %v1759_v42 = vld [vmem:[%s2198_s1 + $0x50] sm:$0xff]  }
 0x4b6   :  { %1625 = vmatmul.mubr.msk.bf16.vlgmr.msra.gmra.mrb[8].mxu0 %vm129_vm2, %v336_v43  ;;  %v1760_v43 = vld [vmem:[%s2198_s1 + $0x58] sm:$0xff]  }
 0x4b7   :  { %1640 = vmatprep.mubr.msk.bf16.mxu0 %vm1841_vm1, %v1840_v16 }
 0x57f   :  { %v252_v45 = vpop.f32.mrb[4].mxu0 }
 0x580   :  { %v1614_v46 = vpop.f32.mrb[5].mxu0 }
 0x581   :  { %v255_v47 = vpop.f32.mrb[6].mxu0 }
 0x582   :  { %v1615_v49 = vpop.f32.mrb[7].mxu0 }
 0x589   :  { %v377_v51 = vpop.f32.mrb[8].mxu0 }
 0x58a   :  { %v1626_v53 = vpop.f32.mrb[9].mxu0 }
 0x58b   :  { %v380_v54 = vpop.f32.mrb[10].mxu0 }
 0x58c   :  { %v1743_v55 = vpack.i.bf16 %v380_v54, %v377_v51  ;;  %v1627_v56 = vpop.f32.mrb[11].mxu0 }
 0x58e   :  { %1744 = vrot.lane.b32.xlu1 %v1743_v55, %s1846_s6 }
 0x600   :  { %v1745_v57 = vpop.permute.xlu1 %1744 }
 0x601   :  { %v1747_v58 = vunpack.i.h.bf16 %v1745_v57  ;;  %v1746_v59 = vunpack.i.l.bf16 %v1745_v57 }
 0x603   :  { %v393_v60 = vsel %vm129_vm2, %v255_v47, %v1747_v58  ;;  %v392_v61 = vsel %vm129_vm2, %v252_v45, %v1746_v59 }
 0x604   :  { %v408_v62 = vpack.c.bf16 %v393_v60, %v392_v61 }
 0x606   :  { %1633 = vmatmul.mubr.msk.bf16.vlgmr.msra.gmra.mrb[8].mxu1 %vm19_vm0, %v408_v62 }
 0x607   :  { %1652 = vmatprep.mubr.msk.bf16.mxu1 %vm1841_vm1, %v1840_v16  ;;  %1645 = vmatpush3.bf16.msra.mxu1 %v1757_v40 }
 0x608   :  { %1646 = vmatprep.subr.bf16.mxu1 %v1840_v16 }
 0x60b   :  { %1647 = vmatpush3.bf16.msra.mxu1 %v1758_v41 }
 0x60c   :  { %1648 = vmatprep.subr.bf16.mxu1 %v1840_v16 }
 0x60f   :  { %1649 = vmatpush3.bf16.msra.mxu1 %v1759_v42 }
 0x610   :  { %1650 = vmatprep.subr.bf16.mxu1 %v1840_v16 }
 0x613   :  { %1651 = vmatpush3.bf16.msra.mxu1 %v1760_v43 }
 0x614   :  { %1670 = vmatprep.subr.bf16.mxu1 %v1840_v16 }
 0x6d9   :  { %v462_v0 = vpop.f32.mrb[8].mxu1 }
 0x6da   :  { %v463_v1 = vadd.f32 %v1979_v63, %v462_v0  ;;  %v1634_v2 = vpop.f32.mrb[9].mxu1 }
 0x6db   :  { %v465_v3 = vpop.f32.mrb[10].mxu1 }
 0x6dc   :  { %v466_v4 = vadd.f32 %v1979_v63, %v465_v3  ;;  %v1635_v5 = vpop.f32.mrb[11].mxu1  ;;  %v469_v6 = vadd.f32 %v463_v1, %v1901_v31 }
 0x6de   :  { %v471_v7 = vsel %vm19_vm0, %v469_v6, 0.0  ;;  %v470_v8 = vadd.f32 %v466_v4, %v1903_v32 }
 0x6df   :  { %472 = vadd.xlane.f32.xlu1 %v471_v7 }
 0x6e0   :  { %v474_v9 = vsel %vm19_vm0, %v470_v8, 0.0 }
 0x6e1   :  { %475 = vadd.xlane.f32.xlu0 %v474_v9 }
 0x6f0   :  { %510 = vrot.lane.b32.xlu1 %v1755_v44, %s1839_s18 }
 0x6f4   :  { %512 = vrot.lane.b32.xlu1 %v1756_v50, %s1839_s18 }
 0x6f8   :  { %517 = vrot.lane.b32.xlu1 %v1979_v63, %s1839_s18 }
 0x6fc   :  { %607 = vrot.lane.b32.xlu1 %v1979_v63, %s1847_s20 }
 0x76c   :  { %v473_v10 = vpop.xlane.xlu1 %472 }
 0x76d   :  { %v477_v11 = vmul.f32 0.03125, %v473_v10 }
 0x76e   :  { %v476_v12 = vpop.xlane.xlu0 %475 }
 0x76f   :  { %v479_v13 = vsub.f32 %v469_v6, %v477_v11  ;;  %v478_v31 = vmul.f32 0.03125, %v476_v12 }
 0x770   :  { %v511_v20 = vpop.permute.xlu1 %510 }
 0x771   :  { %v480_v14 = vsub.f32 %v470_v8, %v478_v31  ;;  %v481_v15 = vmul.f32 %v479_v13, %v479_v13  ;;  %1637 = vmatpush3.bf16.msra.mxu0 %v511_v20 }
 0x772   :  { %1638 = vmatprep.subr.bf16.mxu0 %v1840_v16 }
 0x773   :  { %v483_v32 = vsel %vm19_vm0, %v481_v15, 0.0  ;;  %v482_v17 = vmul.f32 %v480_v14, %v480_v14 }
 0x774   :  { %484 = vadd.xlane.f32.xlu0 %v483_v32  ;;  %v513_v21 = vpop.permute.xlu1 %512 }
 0x775   :  { %v486_v18 = vsel %vm19_vm0, %v482_v17, 0.0  ;;  %1639 = vmatpush3.bf16.msra.mxu0 %v513_v21 }
 0x776   :  { %1656 = vmatprep.subr.bf16.mxu0 %v1840_v16 }
 0x778   :  { %487 = vadd.xlane.f32.xlu0 %v486_v18  ;;  %v518_v44 = vpop.permute.xlu1 %517 }
 0x77c   :  { %v608_v8 = vpop.permute.xlu1 %607 }
 0x78e   :  { %504 = vrot.lane.b32.xlu0 %v1996_v19, %s1839_s18 }
 0x801   :  { %v485_v22 = vpop.xlane.xlu0 %484 }
 0x802   :  { %v489_v23 = vmul.f32 0.03125, %v485_v22 }
 0x804   :  { %v491_v24 = vadd.f32 1e-05, %v489_v23 }
 0x805   :  { %v488_v25 = vpop.xlane.xlu0 %487 }
 0x806   :  { %1793 = vrsqrt.f32 %v491_v24  ;;  %v490_v26 = vmul.f32 0.03125, %v488_v25 }
 0x808   :  { %v492_v27 = vadd.f32 1e-05, %v490_v26 }
 0x809   :  { %v505_v35 = vpop.permute.xlu0 %504 }
 0x80a   :  { %1795 = vrsqrt.f32 %v492_v27 }
 0x810   :  { %v1794_v28 = vpop.eup %1793 }
 0x811   :  { %v495_v29 = vmul.f32 %v1794_v28, %v479_v13 }
 0x813   :  { %v501_v34 = vmul.f32 %v1996_v19, %v495_v29  ;;  %v1761_v29 = vld [vmem:[%s2198_s1 + $0x10] sm:$0xff]  }
 0x814   :  { %v1796_v30 = vpop.eup %1795 }
 0x815   :  { %v496_v33 = vmul.f32 %v1796_v30, %v480_v14  ;;  %v507_v37 = vadd.f32 %v505_v35, %v501_v34  ;;  %v1762_v30 = vld [vmem:[%s2198_s1 + $0x18] sm:$0xff]  }
 0x817   :  { %v502_v36 = vmul.f32 %v1996_v19, %v496_v33 }
 0x819   :  { %v508_v38 = vadd.f32 %v505_v35, %v502_v36 }
 0x81b   :  { %v509_v39 = vpack.c.bf16 %v508_v38, %v507_v37 }
 0x81d   :  { %1641 = vmatmul.mubr.msk.bf16.vlgmr.msra.gmra.mrb[12].mxu0 %vm19_vm0, %v509_v39 }
 0x81e   :  { %1660 = vmatprep.mubr.msk.bf16.mxu0 %vm1841_vm1, %v1840_v16  ;;  %1657 = vmatpush3.bf16.msra.mxu0 %v1761_v29 }
 0x81f   :  { %1658 = vmatprep.subr.bf16.mxu0 %v1840_v16 }
 0x822   :  { %1659 = vmatpush3.bf16.msra.mxu0 %v1762_v30 }
 0x823   :  { %1664 = vmatprep.subr.bf16.mxu0 %v1840_v16 }
 0x8f0   :  { %v557_v45 = vpop.f32.mrb[12].mxu0 }
 0x8f1   :  { %v558_v46 = vadd.f32 %v557_v45, %v518_v44  ;;  %v1642_v47 = vpop.f32.mrb[13].mxu0 }
 0x8f2   :  { %v560_v49 = vpop.f32.mrb[14].mxu0 }
 0x8f3   :  { %v564_v50 = vmul.f32 %v558_v46, %v558_v46  ;;  %v561_v51 = vadd.f32 %v560_v49, %v518_v44  ;;  %v1643_v53 = vpop.f32.mrb[15].mxu0 }
 0x8f5   :  { %v566_v54 = vmul.f32 %v564_v50, %v558_v46  ;;  %v565_v55 = vmul.f32 %v561_v51, %v561_v51  ;;  %v1519_v50 = vld [vmem:[%s2197_s2 + $0x6] ss:$0 sm:$0xff] }
 0x8f7   :  { %v568_v56 = vmul.f32 0.044715, %v566_v54  ;;  %v567_v57 = vmul.f32 %v565_v55, %v561_v51 }
 0x8f9   :  { %v570_v58 = vadd.f32 %v568_v56, %v558_v46  ;;  %v569_v59 = vmul.f32 0.044715, %v567_v57 }
 0x8fb   :  { %v572_v60 = vmul.f32 0.7978846, %v570_v58  ;;  %v571_v61 = vadd.f32 %v569_v59, %v561_v51 }
 0x8fd   :  { %1797 = vtanh.f32 %v572_v60  ;;  %v573_v62 = vmul.f32 0.7978846, %v571_v61 }
 0x8ff   :  { %1799 = vtanh.f32 %v573_v62 }
 0x907   :  { %v1798_v63 = vpop.eup %1797 }
 0x908   :  { %v576_v0 = vadd.f32 1.0, %v1798_v63 }
 0x909   :  { %v1800_v1 = vpop.eup %1799 }
 0x90a   :  { %v578_v2 = vmul.f32 0.5, %v576_v0  ;;  %v577_v3 = vadd.f32 1.0, %v1800_v1 }
 0x90c   :  { %v579_v4 = vmul.f32 0.5, %v577_v3  ;;  %v580_v5 = vmul.f32 %v578_v2, %v558_v46 }
 0x90e   :  { %v581_v6 = vmul.f32 %v579_v4, %v561_v51 }
 0x910   :  { %v582_v7 = vpack.c.bf16 %v581_v6, %v580_v5 }
 0x912   :  { %1653 = vmatmul.mubr.msk.bf16.vlgmr.msra.gmra.mrb[12].mxu1 %vm610_vm3, %v582_v7 }
 0x913   :  { %1672 = vmatprep.mubr.msk.bf16.mxu1 %vm1841_vm1, %v1840_v16 }
 0x9e5   :  { %v648_v9 = vpop.f32.mrb[12].mxu1 }
 0x9e6   :  { %v649_v10 = vadd.f32 %v648_v9, %v608_v8  ;;  %v1654_v11 = vpop.f32.mrb[13].mxu1 }
 0x9e7   :  { %v651_v12 = vpop.f32.mrb[14].mxu1 }
 0x9e8   :  { %v652_v13 = vadd.f32 %v651_v12, %v608_v8  ;;  %v1655_v31 = vpop.f32.mrb[15].mxu1  ;;  %v655_v14 = vadd.f32 %v649_v10, %v507_v37 }
 0x9ea   :  { %v657_v15 = vsel %vm19_vm0, %v655_v14, 0.0  ;;  %v656_v32 = vadd.f32 %v652_v13, %v508_v38 }
 0x9eb   :  { %658 = vadd.xlane.f32.xlu0 %v657_v15 }
 0x9ec   :  { %v660_v17 = vsel %vm19_vm0, %v656_v32, 0.0 }
 0x9ed   :  { %661 = vadd.xlane.f32.xlu1 %v660_v17 }
 0x9fe   :  { %688 = vrot.lane.b32.xlu1 %v1996_v19, %s1847_s20 }
 0xa78   :  { %v659_v18 = vpop.xlane.xlu0 %658 }
 0xa79   :  { %v663_v20 = vmul.f32 0.03125, %v659_v18 }
 0xa7a   :  { %v662_v21 = vpop.xlane.xlu1 %661 }
 0xa7b   :  { %v665_v22 = vsub.f32 %v655_v14, %v663_v20  ;;  %v664_v23 = vmul.f32 0.03125, %v662_v21 }
 0xa7d   :  { %v666_v24 = vsub.f32 %v656_v32, %v664_v23  ;;  %v667_v25 = vmul.f32 %v665_v22, %v665_v22 }
 0xa7e   :  { %v689_v44 = vpop.permute.xlu1 %688 }
 0xa7f   :  { %v669_v26 = vsel %vm19_vm0, %v667_v25, 0.0  ;;  %v668_v27 = vmul.f32 %v666_v24, %v666_v24 }
 0xa80   :  { %670 = vadd.xlane.f32.xlu0 %v669_v26 }
 0xa81   :  { %v672_v28 = vsel %vm19_vm0, %v668_v27, 0.0 }
 0xa84   :  { %673 = vadd.xlane.f32.xlu0 %v672_v28 }
 0xa9a   :  { %683 = vrot.lane.b32.xlu0 %v1996_v19, %s1845_s28 }
 0xb0d   :  { %v671_v33 = vpop.xlane.xlu0 %670 }
 0xb0e   :  { %v675_v34 = vmul.f32 0.03125, %v671_v33 }
 0xb10   :  { %v677_v35 = vadd.f32 1e-05, %v675_v34 }
 0xb11   :  { %v674_v36 = vpop.xlane.xlu0 %673 }
 0xb12   :  { %1801 = vrsqrt.f32 %v677_v35  ;;  %v676_v19 = vmul.f32 0.03125, %v674_v36 }
 0xb14   :  { %v678_v37 = vadd.f32 1e-05, %v676_v19 }
 0xb15   :  { %v684_v40 = vpop.permute.xlu0 %683 }
 0xb16   :  { %1803 = vrsqrt.f32 %v678_v37 }
 0xb1c   :  { %v1802_v38 = vpop.eup %1801 }
 0xb1d   :  { %v681_v39 = vmul.f32 %v1802_v38, %v665_v22 }
 0xb1f   :  { %v686_v43 = vmul.f32 %v684_v40, %v681_v39 }
 0xb20   :  { %v1804_v41 = vpop.eup %1803 }
 0xb21   :  { %v682_v42 = vmul.f32 %v1804_v41, %v666_v24  ;;  %v2044_v46 = vadd.f32 %v689_v44, %v686_v43 }
 0xb23   :  { %v687_v45 = vmul.f32 %v684_v40, %v682_v42 }
 0xb25   :  { %v2046_v47 = vadd.f32 %v689_v44, %v687_v45 }
 0xb27   :  { %v698_v49 = vpack.c.bf16 %v2046_v47, %v2044_v46 }
 0xb29   :  { %1661 = vmatmul.mubr.msk.bf16.vlgmr.msra.gmra.mrb[16].mxu0 %vm19_vm0, %v698_v49 }
 0xb2a   :  { %1666 = vmatprep.mubr.msk.bf16.mxu0 %vm1841_vm1, %v1840_v16 }
 0xbfc   :  { %v752_v51 = vpop.f32.mrb[16].mxu0 }
 0xbfd   :  { %v1662_v53 = vpop.f32.mrb[17].mxu0  ;;  %v753_v55 = vadd.f32 %v1519_v50, %v752_v51 }
 0xbfe   :  { %v755_v54 = vpop.f32.mrb[18].mxu0 }
 0xbff   :  { %v756_v56 = vadd.f32 %v1519_v50, %v755_v54  ;;  %v1663_v57 = vpop.f32.mrb[19].mxu0 }
 0xc01   :  { %v2056_v58 = vpack.c.bf16 %v756_v56, %v753_v55 }
 0xc03   :  { %884 = vrot.lane.b32.xlu0 %v2056_v58, %s1843_s26  ;;  %761 = vrot.lane.b32.xlu1 %v2056_v58, %s1839_s18 }
 0xc07   :  { %886 = vrot.lane.b32.xlu1 %v2056_v58, %s1842_s25 }
 0xc75   :  { %v762_v59 = vpop.permute.xlu1 %761  ;;  %v885_v63 = vpop.permute.xlu0 %884 }
 0xc76   :  { %v767_v60 = vsel %vm129_vm2, %v762_v59, 0  ;;  %v1763_v59 = vld [vmem:[%s2198_s1 + $0x30] sm:$0xff]  }
 0xc77   :  { %1665 = vmatpush3.bf16.xpose.msra.mxu0 %v767_v60 }
 0xc78   :  { %1676 = vmatprep.subr.bf16.mxu0 %v1840_v16 }
 0xc79   :  { %v887_v61 = vpop.permute.xlu1 %886 }
 0xc7a   :  { %v892_v62 = vsel %vm129_vm2, %v887_v61, 0 }
 0xc7e   :  { %1667 = vmatmul.mubr.msk.bf16.vlgmr.msra.gmra.mrb[20].mxu0 %vm129_vm2, %v2056_v58 }
 0xc7f   :  { %1677 = vmatpush3.bf16.xpose.msra.mxu0 %v892_v62  ;;  %1678 = vmatprep.mubr.msk.bf16.mxu0 %vm1841_vm1, %v1840_v16 }
 0xc80   :  { %1688 = vmatprep.subr.bf16.mxu0 %v1840_v16 }
 0xc86   :  { %1679 = vmatmul.mubr.msk.bf16.vlgmr.msra.gmra.mrb[24].mxu0 %vm129_vm2, %v885_v63 }
 0xc87   :  { %1692 = vmatprep.mubr.msk.bf16.mxu0 %vm1841_vm1, %v1840_v16  ;;  %1689 = vmatpush3.bf16.msra.mxu0 %v1763_v59 }
 0xc88   :  { %1690 = vmatprep.subr.bf16.mxu0 %v1840_v16 }
 0xd51   :  { %v803_v0 = vpop.f32.mrb[20].mxu0 }
 0xd52   :  { %v810_v1 = vmul.f32 0.25, %v803_v0  ;;  %v1668_v2 = vpop.f32.mrb[21].mxu0  ;;  %v1764_v0 = vld [vmem:[%s2198_s1 + $0x38] sm:$0xff]  }
 0xd53   :  { %v806_v3 = vpop.f32.mrb[22].mxu0  ;;  %1691 = vmatpush3.bf16.msra.mxu0 %v1764_v0 }
 0xd54   :  { %v811_v4 = vmul.f32 0.25, %v806_v3  ;;  %v1669_v5 = vpop.f32.mrb[23].mxu0  ;;  %v812_v6 = vadd.f32 %v810_v1, %v1934_v48  ;;  %1704 = vmatprep.subr.bf16.mxu0 %v1840_v16 }
 0xd56   :  { %v814_v7 = vsel %vm129_vm2, %v812_v6, -inf  ;;  %v813_v8 = vadd.f32 %v811_v4, %v1936_v52 }
 0xd57   :  { %815 = vmax.xlane.f32.xlu1 %v814_v7 }
 0xd58   :  { %v817_v9 = vsel %vm129_vm2, %v813_v8, -inf }
 0xd59   :  { %818 = vmax.xlane.f32.xlu0 %v817_v9  ;;  %v928_v10 = vpop.f32.mrb[24].mxu0 }
 0xd5a   :  { %v935_v11 = vmul.f32 0.25, %v928_v10  ;;  %v1680_v12 = vpop.f32.mrb[25].mxu0 }
 0xd5b   :  { %v931_v13 = vpop.f32.mrb[26].mxu0  ;;  %v1527_v12 = vld [vmem:[%s2197_s2 + $0x2] ss:$0 sm:$0xff] }
 0xd5c   :  { %v936_v31 = vmul.f32 0.25, %v931_v13  ;;  %v1681_v14 = vpop.f32.mrb[27].mxu0  ;;  %v937_v15 = vadd.f32 %v935_v11, %v1934_v48 }
 0xd5e   :  { %v939_v32 = vsel %vm129_vm2, %v937_v15, -inf  ;;  %v938_v17 = vadd.f32 %v936_v31, %v1936_v52 }
 0xd5f   :  { %940 = vmax.xlane.f32.xlu0 %v939_v32 }
 0xd60   :  { %v942_v18 = vsel %vm129_vm2, %v938_v17, -inf }
 0xd63   :  { %943 = vmax.xlane.f32.xlu0 %v942_v18 }
 0xde4   :  { %v816_v20 = vpop.xlane.xlu1 %815 }
 0xde5   :  { %v820_v21 = vsub.f32 %v812_v6, %v816_v20 }
 0xde6   :  { %v819_v22 = vpop.xlane.xlu0 %818 }
 0xde7   :  { %v822_v23 = vmul.f32 1.442695, %v820_v21  ;;  %v821_v24 = vsub.f32 %v813_v8, %v819_v22 }
 0xde9   :  { %1805 = vpow2.f32 %v822_v23  ;;  %v824_v25 = vmul.f32 1.442695, %v821_v24  ;;  %v2123_v23 = vld [vmem:[%s2197_s2 + $0x4] ss:$0 sm:$0xff] }
 0xdeb   :  { %1807 = vpow2.f32 %v824_v25 }
 0xdec   :  { %v941_v26 = vpop.xlane.xlu0 %940 }
 0xded   :  { %v945_v27 = vsub.f32 %v937_v15, %v941_v26 }
 0xdef   :  { %v947_v28 = vmul.f32 1.442695, %v945_v27 }
 0xdf0   :  { %v944_v48 = vpop.xlane.xlu0 %943 }
 0xdf1   :  { %1809 = vpow2.f32 %v947_v28  ;;  %v946_v29 = vsub.f32 %v938_v17, %v944_v48 }
 0xdf3   :  { %v1806_v30 = vpop.eup %1805  ;;  %v949_v52 = vmul.f32 1.442695, %v946_v29 }
 0xdf4   :  { %v826_v33 = vsel %vm129_vm2, %v1806_v30, 0.0 }
 0xdf5   :  { %v1808_v34 = vpop.eup %1807  ;;  %1811 = vpow2.f32 %v949_v52  ;;  %827 = vadd.xlane.f32.xlu1 %v826_v33 }
 0xdf6   :  { %v829_v35 = vsel %vm129_vm2, %v1808_v34, 0.0 }
 0xdf7   :  { %830 = vadd.xlane.f32.xlu0 %v829_v35 }
 0xdfb   :  { %v1810_v36 = vpop.eup %1809 }
 0xdfc   :  { %v951_v19 = vsel %vm129_vm2, %v1810_v36, 0.0 }
 0xdfd   :  { %952 = vadd.xlane.f32.xlu1 %v951_v19 }
 0xdff   :  { %v1812_v37 = vpop.eup %1811 }
 0xe00   :  { %v954_v38 = vsel %vm129_vm2, %v1812_v37, 0.0 }
 0xe01   :  { %955 = vadd.xlane.f32.xlu0 %v954_v38 }
 0xe0e   :  { %837 = vrot.lane.b32.xlu1 %v2056_v58, %s1845_s28 }
 0xe17   :  { %962 = vrot.lane.b32.xlu0 %v2056_v58, %s1844_s27 }
 0xe82   :  { %v828_v39 = vpop.xlane.xlu1 %827 }
 0xe83   :  { %1813 = vrcp.f32 %v828_v39 }
 0xe84   :  { %v831_v40 = vpop.xlane.xlu0 %830 }
 0xe85   :  { %1815 = vrcp.f32 %v831_v40 }
 0xe8a   :  { %v953_v41 = vpop.xlane.xlu1 %952 }
 0xe8b   :  { %1817 = vrcp.f32 %v953_v41 }
 0xe8d   :  { %v1814_v42 = vpop.eup %1813 }
 0xe8e   :  { %v838_v43 = vpop.permute.xlu1 %837  ;;  %v956_v44 = vpop.xlane.xlu0 %955  ;;  %v834_v49 = vmul.f32 %v1814_v42, %v1806_v30 }
 0xe8f   :  { %v1816_v45 = vpop.eup %1815  ;;  %1819 = vrcp.f32 %v956_v44  ;;  %1671 = vmatpush3.bf16.msra.mxu1 %v838_v43 }
 0xe90   :  { %v835_v50 = vmul.f32 %v1816_v45, %v1808_v34  ;;  %1682 = vmatprep.subr.bf16.mxu1 %v1840_v16 }
 0xe92   :  { %v963_v51 = vpop.permute.xlu0 %962  ;;  %v836_v53 = vpack.c.bf16 %v835_v50, %v834_v49 }
 0xe94   :  { %1673 = vmatmul.mubr.msk.bf16.vlgmr.msra.gmra.mrb[16].mxu1 %vm129_vm2, %v836_v53  ;;  %v1765_v53 = vld [vmem:[%s2198_s1 + $0x60] sm:$0xff]  }
 0xe95   :  { %1683 = vmatpush3.bf16.msra.mxu1 %v963_v51  ;;  %1684 = vmatprep.mubr.msk.bf16.mxu1 %vm1841_vm1, %v1840_v16  ;;  %v1818_v54 = vpop.eup %1817 }
 0xe96   :  { %1696 = vmatprep.subr.bf16.mxu1 %v1840_v16  ;;  %v959_v56 = vmul.f32 %v1818_v54, %v1810_v36  ;;  %v1766_v54 = vld [vmem:[%s2198_s1 + $0x68] sm:$0xff]  }
 0xe99   :  { %v1820_v55 = vpop.eup %1819 }
 0xe9a   :  { %v960_v57 = vmul.f32 %v1820_v55, %v1812_v37  ;;  %v1767_v55 = vld [vmem:[%s2198_s1 + $0x70] sm:$0xff]  }
 0xe9c   :  { %v961_v58 = vpack.c.bf16 %v960_v57, %v959_v56  ;;  %v1768_v56 = vld [vmem:[%s2198_s1 + $0x78] sm:$0xff]  }
 0xe9e   :  { %1685 = vmatmul.mubr.msk.bf16.vlgmr.msra.gmra.mrb[20].mxu1 %vm129_vm2, %v961_v58 }
 0xe9f   :  { %1700 = vmatprep.mubr.msk.bf16.mxu1 %vm1841_vm1, %v1840_v16 }
 0xf67   :  { %v877_v60 = vpop.f32.mrb[16].mxu1 }
 0xf68   :  { %v1674_v61 = vpop.f32.mrb[17].mxu1 }
 0xf69   :  { %v880_v62 = vpop.f32.mrb[18].mxu1 }
 0xf6a   :  { %v1675_v63 = vpop.f32.mrb[19].mxu1 }
 0xf71   :  { %v1002_v1 = vpop.f32.mrb[20].mxu1 }
 0xf72   :  { %v1686_v2 = vpop.f32.mrb[21].mxu1 }
 0xf73   :  { %v1005_v3 = vpop.f32.mrb[22].mxu1 }
 0xf74   :  { %v1748_v4 = vpack.i.bf16 %v1005_v3, %v1002_v1  ;;  %v1687_v5 = vpop.f32.mrb[23].mxu1 }
 0xf76   :  { %1749 = vrot.lane.b32.xlu1 %v1748_v4, %s1846_s6 }
 0xfe8   :  { %v1750_v6 = vpop.permute.xlu1 %1749 }
 0xfe9   :  { %v1752_v7 = vunpack.i.h.bf16 %v1750_v6  ;;  %v1751_v8 = vunpack.i.l.bf16 %v1750_v6 }
 0xfeb   :  { %v1018_v9 = vsel %vm129_vm2, %v880_v62, %v1752_v7  ;;  %v1017_v10 = vsel %vm129_vm2, %v877_v60, %v1751_v8 }
 0xfec   :  { %v1033_v11 = vpack.c.bf16 %v1018_v9, %v1017_v10 }
 0xfee   :  { %1693 = vmatmul.mubr.msk.bf16.vlgmr.msra.gmra.mrb[28].mxu0 %vm19_vm0, %v1033_v11 }
 0xfef   :  { %1712 = vmatprep.mubr.msk.bf16.mxu0 %vm1841_vm1, %v1840_v16  ;;  %1705 = vmatpush3.bf16.msra.mxu0 %v1765_v53 }
 0xff0   :  { %1706 = vmatprep.subr.bf16.mxu0 %v1840_v16 }
 0xff3   :  { %1707 = vmatpush3.bf16.msra.mxu0 %v1766_v54 }
 0xff4   :  { %1708 = vmatprep.subr.bf16.mxu0 %v1840_v16 }
 0xff7   :  { %1709 = vmatpush3.bf16.msra.mxu0 %v1767_v55 }
 0xff8   :  { %1710 = vmatprep.subr.bf16.mxu0 %v1840_v16 }
 0xffb   :  { %1711 = vmatpush3.bf16.msra.mxu0 %v1768_v56 }
0x10c1   :  { %v1087_v13 = vpop.f32.mrb[28].mxu0 }
0x10c2   :  { %v1088_v31 = vadd.f32 %v1527_v12, %v1087_v13  ;;  %v1694_v14 = vpop.f32.mrb[29].mxu0 }
0x10c3   :  { %v1090_v15 = vpop.f32.mrb[30].mxu0 }
0x10c4   :  { %v1091_v32 = vadd.f32 %v1527_v12, %v1090_v15  ;;  %v1695_v17 = vpop.f32.mrb[31].mxu0  ;;  %v1094_v18 = vadd.f32 %v1088_v31, %v2044_v46 }
0x10c6   :  { %v1096_v20 = vsel %vm19_vm0, %v1094_v18, 0.0  ;;  %v1095_v21 = vadd.f32 %v1091_v32, %v2046_v47 }
0x10c7   :  { %1097 = vadd.xlane.f32.xlu1 %v1096_v20 }
0x10c8   :  { %v1099_v22 = vsel %vm19_vm0, %v1095_v21, 0.0 }
0x10c9   :  { %1100 = vadd.xlane.f32.xlu0 %v1099_v22 }
0x10d8   :  { %1129 = vrot.lane.b32.xlu1 %v2123_v23, %s1839_s18 }
0x1154   :  { %v1098_v24 = vpop.xlane.xlu1 %1097 }
0x1155   :  { %v1102_v25 = vmul.f32 0.03125, %v1098_v24 }
0x1156   :  { %v1101_v26 = vpop.xlane.xlu0 %1100 }
0x1157   :  { %v1104_v46 = vsub.f32 %v1094_v18, %v1102_v25  ;;  %v1103_v27 = vmul.f32 0.03125, %v1101_v26 }
0x1158   :  { %v1130_v52 = vpop.permute.xlu1 %1129 }
0x1159   :  { %v1105_v28 = vsub.f32 %v1095_v21, %v1103_v27  ;;  %v1106_v48 = vmul.f32 %v1104_v46, %v1104_v46 }
0x115b   :  { %v1108_v47 = vsel %vm19_vm0, %v1106_v48, 0.0  ;;  %v1107_v29 = vmul.f32 %v1105_v28, %v1105_v28 }
0x115c   :  { %1109 = vadd.xlane.f32.xlu0 %v1108_v47 }
0x115d   :  { %v1111_v30 = vsel %vm19_vm0, %v1107_v29, 0.0 }
0x115e   :  { %1112 = vadd.xlane.f32.xlu1 %v1111_v30 }
0x116f   :  { %1137 = vrot.lane.b32.xlu1 %v1764_v0, %s1839_s18 }
0x1172   :  { %1135 = vrot.lane.b32.xlu0 %v1763_v59, %s1839_s18 }
0x1173   :  { %1142 = vrot.lane.b32.xlu1 %v1527_v12, %s1839_s18 }
0x1176   :  { %1232 = vrot.lane.b32.xlu0 %v1527_v12, %s1847_s20 }
0x11e9   :  { %v1110_v33 = vpop.xlane.xlu0 %1109 }
0x11ea   :  { %v1114_v34 = vmul.f32 0.03125, %v1110_v33 }
0x11eb   :  { %v1113_v35 = vpop.xlane.xlu1 %1112 }
0x11ec   :  { %v1116_v36 = vadd.f32 1e-05, %v1114_v34  ;;  %v1115_v19 = vmul.f32 0.03125, %v1113_v35 }
0x11ed   :  { %v1136_v37 = vpop.permute.xlu0 %1135 }
0x11ee   :  { %1821 = vrsqrt.f32 %v1116_v36  ;;  %v1117_v38 = vadd.f32 1e-05, %v1115_v19  ;;  %1697 = vmatpush3.bf16.msra.mxu1 %v1136_v37 }
0x11ef   :  { %v1138_v39 = vpop.permute.xlu1 %1137  ;;  %1698 = vmatprep.subr.bf16.mxu1 %v1840_v16 }
0x11f0   :  { %1823 = vrsqrt.f32 %v1117_v38  ;;  %v1769_v38 = vld [vmem:[%s2198_s1 + $0x80] sm:$0xff]  }
0x11f1   :  { %v1233_v18 = vpop.permute.xlu0 %1232 }
0x11f2   :  { %1699 = vmatpush3.bf16.msra.mxu1 %v1138_v39  ;;  %v1770_v39 = vld [vmem:[%s2198_s1 + $0x88] sm:$0xff]  }
0x11f3   :  { %1716 = vmatprep.subr.bf16.mxu1 %v1840_v16  ;;  %v1143_v57 = vpop.permute.xlu1 %1142 }
0x11f8   :  { %v1822_v40 = vpop.eup %1821 }
0x11f9   :  { %v1120_v41 = vmul.f32 %v1822_v40, %v1104_v46 }
0x11fa   :  { %v1824_v42 = vpop.eup %1823 }
0x11fb   :  { %v1126_v43 = vmul.f32 %v2123_v23, %v1120_v41  ;;  %v1121_v44 = vmul.f32 %v1824_v42, %v1105_v28 }
0x11fd   :  { %v1127_v45 = vmul.f32 %v2123_v23, %v1121_v44  ;;  %v1132_v49 = vadd.f32 %v1130_v52, %v1126_v43 }
0x11ff   :  { %v1133_v50 = vadd.f32 %v1130_v52, %v1127_v45 }
0x1201   :  { %v1134_v51 = vpack.c.bf16 %v1133_v50, %v1132_v49 }
0x1203   :  { %1701 = vmatmul.mubr.msk.bf16.vlgmr.msra.gmra.mrb[24].mxu1 %vm19_vm0, %v1134_v51 }
0x1204   :  { %1720 = vmatprep.mubr.msk.bf16.mxu1 %vm1841_vm1, %v1840_v16  ;;  %1717 = vmatpush3.bf16.msra.mxu1 %v1769_v38 }
0x1205   :  { %1718 = vmatprep.subr.bf16.mxu1 %v1840_v16 }
0x1208   :  { %1719 = vmatpush3.bf16.msra.mxu1 %v1770_v39 }
0x1209   :  { %1724 = vmatprep.subr.bf16.mxu1 %v1840_v16 }
0x12d6   :  { %v1182_v58 = vpop.f32.mrb[24].mxu1 }
0x12d7   :  { %v1183_v59 = vadd.f32 %v1182_v58, %v1143_v57  ;;  %v1702_v60 = vpop.f32.mrb[25].mxu1 }
0x12d8   :  { %v1185_v61 = vpop.f32.mrb[26].mxu1 }
0x12d9   :  { %v1189_v62 = vmul.f32 %v1183_v59, %v1183_v59  ;;  %v1186_v63 = vadd.f32 %v1185_v61, %v1143_v57  ;;  %v1703_v0 = vpop.f32.mrb[27].mxu1 }
0x12da   :  { %v17_v0 = vld [vmem:[%s2196_s0] sm:$0x3] }
0x12db   :  { %v1191_v1 = vmul.f32 %v1189_v62, %v1183_v59  ;;  %v1190_v2 = vmul.f32 %v1186_v63, %v1186_v63  ;;  %v1771_v62 = vld [vmem:[%s2198_s1 + $0x90] sm:$0xff]  }
0x12dd   :  { %v1193_v3 = vmul.f32 0.044715, %v1191_v1  ;;  %v1192_v4 = vmul.f32 %v1190_v2, %v1186_v63  ;;  %v1538_v1 = vld [vmem:[%s2197_s2 + $0x7] ss:$0 sm:$0xff] }
0x12df   :  { %v1195_v5 = vadd.f32 %v1193_v3, %v1183_v59  ;;  %v1194_v6 = vmul.f32 0.044715, %v1192_v4 }
0x12e1   :  { %v1197_v7 = vmul.f32 0.7978846, %v1195_v5  ;;  %v1196_v8 = vadd.f32 %v1194_v6, %v1186_v63 }
0x12e3   :  { %1825 = vtanh.f32 %v1197_v7  ;;  %v1198_v9 = vmul.f32 0.7978846, %v1196_v8  ;;  %v1542_v8 = vld [vmem:[%s2197_s2 + $0x8] ss:$0 sm:$0xff] }
0x12e5   :  { %1827 = vtanh.f32 %v1198_v9 }
0x12ed   :  { %v1826_v10 = vpop.eup %1825 }
0x12ee   :  { %v1201_v11 = vadd.f32 1.0, %v1826_v10 }
0x12ef   :  { %v1828_v12 = vpop.eup %1827 }
0x12f0   :  { %v1203_v13 = vmul.f32 0.5, %v1201_v11  ;;  %v1202_v31 = vadd.f32 1.0, %v1828_v12 }
0x12f2   :  { %v1204_v14 = vmul.f32 0.5, %v1202_v31  ;;  %v1205_v15 = vmul.f32 %v1203_v13, %v1183_v59 }
0x12f4   :  { %v1206_v32 = vmul.f32 %v1204_v14, %v1186_v63  ;;  %v1772_v63 = vld [vmem:[%s2198_s1 + $0x98] sm:$0xff]  }
0x12f6   :  { %v1207_v17 = vpack.c.bf16 %v1206_v32, %v1205_v15 }
0x12f8   :  { %1713 = vmatmul.mubr.msk.bf16.vlgmr.msra.gmra.mrb[32].mxu0 %vm610_vm3, %v1207_v17 }
0x13cb   :  { %v1272_v20 = vpop.f32.mrb[32].mxu0 }
0x13cc   :  { %v1273_v21 = vadd.f32 %v1272_v20, %v1233_v18  ;;  %v1714_v22 = vpop.f32.mrb[33].mxu0 }
0x13cd   :  { %v1275_v24 = vpop.f32.mrb[34].mxu0 }
0x13ce   :  { %v1276_v25 = vadd.f32 %v1275_v24, %v1233_v18  ;;  %v1715_v26 = vpop.f32.mrb[35].mxu0  ;;  %v1279_v46 = vadd.f32 %v1273_v21, %v1132_v49 }
0x13d0   :  { %v1281_v27 = vsel %vm19_vm0, %v1279_v46, 0.0  ;;  %v1280_v28 = vadd.f32 %v1276_v25, %v1133_v50 }
0x13d1   :  { %1282 = vadd.xlane.f32.xlu0 %v1281_v27 }
0x13d2   :  { %v1284_v48 = vsel %vm19_vm0, %v1280_v28, 0.0 }
0x13d3   :  { %1285 = vadd.xlane.f32.xlu1 %v1284_v48 }
0x13e4   :  { %1307 = vrot.lane.b32.xlu1 %v2123_v23, %s1845_s28 }
0x145e   :  { %v1283_v47 = vpop.xlane.xlu0 %1282 }
0x145f   :  { %v1287_v29 = vmul.f32 0.03125, %v1283_v47 }
0x1460   :  { %v1286_v30 = vpop.xlane.xlu1 %1285 }
0x1461   :  { %v1288_v52 = vmul.f32 0.03125, %v1286_v30  ;;  %v1289_v33 = vsub.f32 %v1279_v46, %v1287_v29 }
0x1463   :  { %v1290_v34 = vsub.f32 %v1280_v28, %v1288_v52  ;;  %v1291_v19 = vmul.f32 %v1289_v33, %v1289_v33 }
0x1464   :  { %v1308_v49 = vpop.permute.xlu1 %1307 }
0x1465   :  { %v1292_v35 = vmul.f32 %v1290_v34, %v1290_v34  ;;  %v1293_v37 = vsel %vm19_vm0, %v1291_v19, 0.0 }
0x1467   :  { %v1296_v36 = vsel %vm19_vm0, %v1292_v35, 0.0 }
0x1468   :  { %1297 = vadd.xlane.f32.xlu0 %v1296_v36  ;;  %v1489_v36 = vlaneseq }
0x146a   :  { %v1490_v19 = vand.u32 127, %v1489_v36 }
0x146c   :  { %1294 = vadd.xlane.f32.xlu0 %v1293_v37  ;;  %vm1491_vm7 = vcmp.eq.s32.totalorder %v1490_v19, 2 }
0x1482   :  { %1312 = vrot.lane.b32.xlu0 %v2123_v23, %s1847_s20 }
0x1486   :  { %1467 = vrot.lane.b32.xlu0 %v17_v0, %s1842_s25 }
0x14f5   :  { %v1298_v40 = vpop.xlane.xlu0 %1297 }
0x14f6   :  { %v1300_v41 = vmul.f32 0.03125, %v1298_v40 }
0x14f8   :  { %v1302_v42 = vadd.f32 1e-05, %v1300_v41 }
0x14f9   :  { %v1295_v43 = vpop.xlane.xlu0 %1294 }
0x14fa   :  { %1829 = vrsqrt.f32 %v1302_v42  ;;  %v1299_v23 = vmul.f32 0.03125, %v1295_v43 }
0x14fc   :  { %v1301_v44 = vadd.f32 1e-05, %v1299_v23 }
0x14fd   :  { %v1313_v51 = vpop.permute.xlu0 %1312 }
0x14fe   :  { %1831 = vrsqrt.f32 %v1301_v44 }
0x1501   :  { %v1468_v10 = vpop.permute.xlu0 %1467 }
0x1504   :  { %v1830_v45 = vpop.eup %1829 }
0x1505   :  { %v1306_v50 = vmul.f32 %v1830_v45, %v1290_v34 }
0x1507   :  { %v1311_v53 = vmul.f32 %v1308_v49, %v1306_v50 }
0x1508   :  { %v1832_v54 = vpop.eup %1831 }
0x1509   :  { %v1305_v55 = vmul.f32 %v1832_v54, %v1289_v33  ;;  %v1316_v56 = vadd.f32 %v1313_v51, %v1311_v53 }
0x150b   :  { %v1310_v57 = vmul.f32 %v1308_v49, %v1305_v55  ;;  %v1318_v59 = vrot.slane %v1316_v56, 7 }
0x150d   :  { %v1315_v58 = vadd.f32 %v1313_v51, %v1310_v57 }
0x150f   :  { %v1321_v60 = vsel %vm1320_vm4, %v1315_v58, %v1318_v59 }
0x1510   :  { %v1332_v61 = vpack.c.bf16 %v1321_v60, %v1321_v60 }
0x1512   :  { %1721 = vmatmul.mubr.msk.bf16.vlgmr.msra.gmra.mrb[28].mxu1 %vm19_vm0, %v1332_v61 }
0x1513   :  { %1728 = vmatprep.mubr.msk.bf16.mxu1 %vm1841_vm1, %v1840_v16  ;;  %1725 = vmatpush3.bf16.msra.mxu1 %v1771_v62 }
0x1514   :  { %1726 = vmatprep.subr.bf16.mxu1 %v1840_v16 }
0x1517   :  { %1727 = vmatpush3.bf16.msra.mxu1 %v1772_v63 }
0x15e5   :  { %v1386_v2 = vpop.f32.mrb[28].mxu1 }
0x15e6   :  { %v1387_v3 = vadd.f32 %v1538_v1, %v1386_v2  ;;  %v1722_v4 = vpop.f32.mrb[29].mxu1 }
0x15e7   :  { %v1389_v5 = vpop.f32.mrb[30].mxu1 }
0x15e8   :  { %1833 = vtanh.f32 %v1387_v3  ;;  %v1723_v16 = vpop.f32.mrb[31].mxu1 }
0x15f2   :  { %v1834_v6 = vpop.eup %1833 }
0x15f3   :  { %v1393_v7 = vpack.c.bf16 %v1834_v6, %v1834_v6 }
0x15f5   :  { %1729 = vmatmul.mubr.msk.bf16.vlgmr.msra.gmra.mrb[32].mxu1 %vm19_vm0, %v1393_v7 }
0x16c8   :  { %v1447_v9 = vpop.f32.mrb[32].mxu1 }
0x16c9   :  { %v1448_v11 = vadd.f32 %v1542_v8, %v1447_v9  ;;  %v1730_v12 = vpop.f32.mrb[33].mxu1 }
0x16ca   :  { %v1450_v13 = vpop.f32.mrb[34].mxu1 }
0x16cb   :  { %v1470_v31 = vmul.f32 %v1468_v10, %v1448_v11  ;;  %v1731_v14 = vpop.f32.mrb[35].mxu1  ;;  %v1454_v15 = vsel %vm1453_vm5, %v1448_v11, -inf }
0x16cc   :  { %1455 = vmax.xlane.f32.xlu1 %v1454_v15 }
0x16cd   :  { %v1471_v32 = vsel %vm1453_vm5, %v1470_v31, 0.0 }
0x16d0   :  { %1472 = vadd.xlane.f32.xlu1 %v1471_v32 }
0x1759   :  { %v1456_v17 = vpop.xlane.xlu1 %1455 }
0x175a   :  { %v1457_v18 = vsub.f32 %v1448_v11, %v1456_v17 }
0x175c   :  { %v1458_v20 = vmul.f32 1.442695, %v1457_v18 }
0x175d   :  { %v1473_v27 = vpop.xlane.xlu1 %1472 }
0x175e   :  { %1835 = vpow2.f32 %v1458_v20 }
0x1768   :  { %v1836_v21 = vpop.eup %1835 }
0x1769   :  { %v1460_v22 = vsel %vm1453_vm5, %v1836_v21, 0.0 }
0x176a   :  { %1461 = vadd.xlane.f32.xlu0 %v1460_v22 }
0x17f7   :  { %v1462_v24 = vpop.xlane.xlu0 %1461 }
0x17f8   :  { %1837 = vlog2.f32 %v1462_v24 }
0x1802   :  { %v1838_v25 = vpop.eup %1837 }
0x1803   :  { %v1464_v26 = vmul.f32 0.6931472, %v1838_v25 }
0x1805   :  { %v1465_v46 = vadd.f32 %v1464_v26, %v1456_v17 }
0x1807   :  { %v1474_v28 = vsub.f32 %v1465_v46, %v1473_v27 }
0x1809   :  { %v1476_v48 = vsel %vm1475_vm6, %v1474_v28, 0.0 }
0x180a   :  { %1477 = vadd.xlane.f32.xlu1 %v1476_v48 }
0x1897   :  { %v1478_v47 = vpop.xlane.xlu1 %1477 }
0x1898   :  { %v1479_v29 = vrot.slane %v1478_v47, 4 }
0x189a   :  { %v1480_v30 = vadd.f32 %v1479_v29, %v1478_v47 }
0x189c   :  { %v1481_v52 = vrot.slane %v1480_v30, 2 }
0x189e   :  { %v1482_v33 = vadd.f32 %v1481_v52, %v1480_v30 }
0x18a0   :  { %v1483_v34 = vrot.slane %v1482_v33, 1 }
0x18a2   :  { %v1484_v35 = vadd.f32 %v1483_v34, %v1482_v33 }
0x18a4   :  { %1732 = vpush %v1484_v35 }
0x18d5   :  { %s1733_s0 = spop %1732 }
0x18d6   :  { %s1488_s2 = smul.f32 0.5, %s1733_s0 }
0x18d8   :  { %v1492_v37 = vstv %s1488_s2 }
0x18d9   :  { %v1493_v38 = vsel %vm1491_vm7, %v1492_v37, %v1448_v11 }
0x18da   :  { %1494 = vst [vmem:[%s2199_s3] sm:$0x3] %v1493_v38 }

</bundles_post_ra>
